<compile_context>
chip_gen: v5e
topology: v5e:2x2
jax: 0.10.0
libtpu: 0.0.40
codegen_flags: <defaults>
</compile_context>

<pallas_src>
import functools
import math

import jax
import jax.numpy as jnp
import numpy as np
from jax import lax
from jax.experimental import pallas as pl
from jax.experimental.pallas import tpu as pltpu


def _cfe_kernel(scalars_ref,                       # SMEM (4,): alpha, beta, gamma, delta
                tv_ref, tl_ref,                    # (bt*S, D) each
                mask_ref,                          # (H, D) f32 per-head feature mask
                wq_ref, bq_ref, wk_ref, bk_ref,    # weights bf16 (D, D), biases f32 (1, D)
                wv_ref, bv_ref, wo_ref, bo_ref,
                w1_ref, b1_ref, w2_ref, b2_ref,    # ffn: (D, 4D) bf16, (1, 4D) f32, (4D, D) bf16, (1, D) f32
                out_ref,                           # (bt*S, D)
                *, num_heads, head_dim, bt, seq, ffn_chunk):
    S, H = seq, num_heads
    D = H * head_dim
    H4 = 4 * D
    bf, f32 = jnp.bfloat16, jnp.float32

    tl = tl_ref[...].astype(f32)                   # f32 copy for the residual
    tv_b = tv_ref[...].astype(bf)
    tl_b = tl.astype(bf)

    # ---- Q / K / V projections (1/sqrt(hd) pre-folded into W_q, b_q) --------
    q = jnp.dot(tv_b, wq_ref[...], preferred_element_type=f32) + bq_ref[...]
    k = jnp.dot(tl_b, wk_ref[...], preferred_element_type=f32) + bk_ref[...]
    v = jnp.dot(tl_b, wv_ref[...], preferred_element_type=f32) + bv_ref[...]

    # ---- multi-head cross attention, heads expanded on the batch axis -------
    # k/v are masked per head on the feature axis; q is just replicated.  For
    # flattened batch index b*H + h:
    #   s[bh, q, s'] = sum_{d in head h} Q[b,q,d] * K[b,s',d]       (head-h scores)
    #   z[bh, q, d]  = (A_h @ V)[q, d] restricted to head h's feature slice
    # so summing z over h reproduces the head-concatenated output in order.
    mask = mask_ref[...]                                            # (H, D) f32
    q4 = jnp.broadcast_to(q.reshape(bt, 1, S, D), (bt, H, S, D))
    k4 = k.reshape(bt, 1, S, D) * mask[None, :, None, :]
    v4 = v.reshape(bt, 1, S, D) * mask[None, :, None, :]
    q_e = q4.reshape(bt * H, S, D).astype(bf)
    k_e = k4.reshape(bt * H, S, D).astype(bf)
    v_e = v4.reshape(bt * H, S, D).astype(bf)
    # TODO(synk): for head_dim >= 128, switch to a per-head batched contraction
    # (no masked expansion) to avoid the num_heads x MXU-FLOP / vreg inflation.

    s = jnp.einsum("bqd,bkd->bqk", q_e, k_e,
                   preferred_element_type=f32)                      # (bt*H, S, S)

    # Softmax over the key axis — per head by construction (no global-max hazard).
    m = jnp.max(s, axis=-1, keepdims=True)
    p = jnp.exp(s - m)
    denom = jnp.sum(p, axis=-1, keepdims=True)                      # > 0 always
    pn = (p * pl.reciprocal(denom, approx=True)).astype(bf)

    z = jnp.einsum("bqk,bkd->bqd", pn, v_e,
                   preferred_element_type=f32)                      # (bt*H, S, D)
    z = jnp.sum(z.reshape(bt, H, S, D), axis=1).reshape(bt * S, D)  # head concat

    # ---- output projection, residual mix, FFN --------------------------------
    zo = jnp.dot(z.astype(bf), wo_ref[...], preferred_element_type=f32) + bo_ref[...]

    alpha = scalars_ref[0]
    beta = scalars_ref[1]
    gamma = scalars_ref[2]
    delta = scalars_ref[3]

    tlp = alpha * zo + beta * tl                                    # T_L' (f32)
    tlp_b = tlp.astype(bf)

    # FFN chunked over the 4*D hidden dim: bounds the live h1 slab to
    # (bt*S, ffn_chunk) instead of (bt*S, 4D).
    ffn = jnp.zeros((bt * S, D), f32)
    for c0 in range(0, H4, ffn_chunk):
        cw = min(ffn_chunk, H4 - c0)
        h1 = jnp.dot(tlp_b, w1_ref[:, c0:c0 + cw],
                     preferred_element_type=f32) + b1_ref[:, c0:c0 + cw]
        h1 = jnp.maximum(h1, 0.0).astype(bf)
        ffn = ffn + jnp.dot(h1, w2_ref[c0:c0 + cw, :], preferred_element_type=f32)
    ffn = ffn + b2_ref[...]

    out_ref[...] = (gamma * tlp + delta * ffn).astype(out_ref.dtype)


def _device_vmem_and_cores():
    """Best-effort chip query: (VMEM capacity bytes, TensorCores per chip)."""
    kind = ""
    try:
        kind = jax.devices()[0].device_kind.lower()
    except Exception:
        pass
    vmem = None
    try:
        vmem = int(pltpu.get_tpu_info().vmem_capacity_bytes)
    except Exception:
        vmem = None
    if not vmem:
        vmem = (64 << 20) if "v7" in kind else (128 << 20)
    num_tc = 2 if "v7" in kind else 1
    return vmem, num_tc


def _pick_block_batch(batch, seq, *, min_steps=1, target_rows=512):
    """Largest divisor of `batch` packing <= target_rows rows per grid step,
    honoring the (8,128) sublane rule and (if possible) >= min_steps grid steps."""
    def valid(c):
        rows = c * seq
        return c == batch or rows % 8 == 0      # full array OR sublane-aligned
    cands = [c for c in range(1, batch + 1) if batch % c == 0 and valid(c)]
    if not cands:
        return batch
    pref = [c for c in cands if batch // c >= min_steps] or cands
    within = [c for c in pref if c * seq <= max(target_rows, seq)]
    return max(within) if within else min(pref)


def cross_feature_enhancement(T_V, T_L, params, *, num_heads, block_batch=None):
    B, S, D = T_V.shape
    assert D % num_heads == 0
    head_dim = D // num_heads
    H4 = 4 * D

    vmem_cap, num_tc = _device_vmem_and_cores()
    # Leave headroom for Mosaic internal scratch / spill slots (~85% of capacity):
    # ~54 MiB on v7x, ~108 MiB on v5e/v6e.
    vmem_limit = int(min(vmem_cap * 0.85, vmem_cap - (8 << 20)))
    target_rows = 512 if vmem_cap >= (96 << 20) else 256

    bt = block_batch if block_batch is not None else _pick_block_batch(
        B, S, min_steps=num_tc, target_rows=target_rows)
    assert B % bt == 0
    grid = (B // bt,)

    # Flatten (B, S, D) -> (B*S, D): rows are the matmul M dimension; each grid
    # step owns a lane-dense (bt*S, D) tile.
    tv2 = T_V.reshape(B * S, D)
    tl2 = T_L.reshape(B * S, D)

    # Weights streamed in bf16 (native MXU mode); biases stay f32. The
    # attention scale is folded into W_q / b_q here so the kernel never scales Q.
    bf = jnp.bfloat16
    scale = jnp.float32(1.0 / math.sqrt(head_dim))
    wq = (params["W_q"] * scale).astype(bf)
    bq = params["b_q"] * scale
    wk = params["W_k"].astype(bf)
    wv = params["W_v"].astype(bf)
    wo = params["W_o"].astype(bf)
    w1 = params["W1"].astype(bf)
    w2 = params["W2"].astype(bf)

    # Constant per-head feature mask (H, D): mask[h, d] = (d // head_dim == h).
    head_mask = (jnp.arange(D)[None, :] // head_dim
                 == jnp.arange(num_heads)[:, None]).astype(jnp.float32)

    ffn_chunk = H4 if H4 <= 512 else 512

    kernel = functools.partial(_cfe_kernel, num_heads=num_heads,
                               head_dim=head_dim, bt=bt, seq=S,
                               ffn_chunk=ffn_chunk)

    io_spec = pl.BlockSpec((bt * S, D), lambda i: (i, 0))

    def _run(single_buffer_weights):
        if single_buffer_weights:
            def full(shape):
                # Grid-invariant operand: one VMEM buffer is enough.
                return pl.BlockSpec(shape, lambda i: (0, 0),
                                    pipeline_mode=pl.Buffered(1))
        else:
            def full(shape):
                return pl.BlockSpec(shape, lambda i: (0, 0))

        return pl.pallas_call(
            kernel,
            out_shape=jax.ShapeDtypeStruct((B * S, D), T_L.dtype),
            grid=grid,
            in_specs=[
                pl.BlockSpec(memory_space=pltpu.SMEM),      # alpha/beta/gamma/delta
                io_spec, io_spec,                           # T_V, T_L (flattened)
                full((num_heads, D)),                       # per-head feature mask
                full((D, D)), full((1, D)),                 # W_q (pre-scaled), b_q
                full((D, D)), full((1, D)),                 # W_k, b_k
                full((D, D)), full((1, D)),                 # W_v, b_v
                full((D, D)), full((1, D)),                 # W_o, b_o
                full((D, H4)), full((1, H4)),               # ffn W1, b1
                full((H4, D)), full((1, D)),                # ffn W2, b2
            ],
            out_specs=io_spec,
            compiler_params=pltpu.CompilerParams(
                dimension_semantics=("parallel",),
                vmem_limit_bytes=vmem_limit,
            ),
        )(
            params["scalars"], tv2, tl2, head_mask,
            wq, bq, wk, params["b_k"],
            wv, params["b_v"], wo, params["b_o"],
            w1, params["b1"], w2, params["b2"],
        )

    try:
        out2 = _run(True)
    except Exception:
        # Older JAX without pipeline_mode=pl.Buffered(1) support on BlockSpec.
        out2 = _run(False)
    return out2.reshape(B, S, D)


def _reference(T_V, T_L, params, *, num_heads):
    """Pure-JAX reference mirroring the PyTorch forward, with the same mixed
    precision as the kernel (bf16 matmul operands, f32 accumulation)."""
    B, S, D = T_V.shape
    hd = D // num_heads
    a, b, g, d = params["scalars"]
    bf, f32 = jnp.bfloat16, jnp.float32

    def lin(x, W, bias):
        return jnp.dot(x.astype(bf), W.astype(bf), preferred_element_type=f32) + bias[0]

    q = lin(T_V, params["W_q"], params["b_q"])
    k = lin(T_L, params["W_k"], params["b_k"])
    v = lin(T_L, params["W_v"], params["b_v"])

    def split(x):   # (B, S, D) -> (B, H, S, hd)
        return x.reshape(B, S, num_heads, hd).transpose(0, 2, 1, 3)

    qh, kh, vh = split(q), split(k), split(v)
    A = jnp.einsum("bhqd,bhkd->bhqk", qh.astype(bf), kh.astype(bf),
                   preferred_element_type=f32) / jnp.sqrt(jnp.float32(hd))
    A = jax.nn.softmax(A, axis=-1)
    z = jnp.einsum("bhqk,bhkd->bhqd", A.astype(bf), vh.astype(bf),
                   preferred_element_type=f32)
    z = z.transpose(0, 2, 1, 3).reshape(B, S, D)
    z = lin(z, params["W_o"], params["b_o"])
    tlp = a * z + b * T_L
    ffn = lin(jnp.maximum(lin(tlp, params["W1"], params["b1"]), 0.0),
              params["W2"], params["b2"])
    return g * tlp + d * ffn


def init_params(key, D):
    H = 4 * D
    ks = jax.random.split(key, 12)
    scale = 1.0 / np.sqrt(D)
    return {
        "W_q": jax.random.normal(ks[0], (D, D), jnp.float32) * scale,
        "b_q": jax.random.normal(ks[1], (1, D), jnp.float32) * 0.1,
        "W_k": jax.random.normal(ks[2], (D, D), jnp.float32) * scale,
        "b_k": jax.random.normal(ks[3], (1, D), jnp.float32) * 0.1,
        "W_v": jax.random.normal(ks[4], (D, D), jnp.float32) * scale,
        "b_v": jax.random.normal(ks[5], (1, D), jnp.float32) * 0.1,
        "W_o": jax.random.normal(ks[6], (D, D), jnp.float32) * scale,
        "b_o": jax.random.normal(ks[7], (1, D), jnp.float32) * 0.1,
        "W1": jax.random.normal(ks[8], (D, H), jnp.float32) * scale,
        "b1": jax.random.normal(ks[9], (1, H), jnp.float32) * 0.1,
        "W2": jax.random.normal(ks[10], (H, D), jnp.float32) * (1.0 / np.sqrt(H)),
        "b2": jax.random.normal(ks[11], (1, D), jnp.float32) * 0.1,
        # alpha, beta, gamma, delta (PyTorch init: 1.0 each)
        "scalars": jnp.array([1.0, 1.0, 1.0, 1.0], jnp.float32),
    }


if __name__ == "__main__":
    B, S, D, NUM_HEADS = 2, 8, 32, 8

    key = jax.random.PRNGKey(0)
    k_tv, k_tl, k_p = jax.random.split(key, 3)
    T_V = jax.random.normal(k_tv, (B, S, D), jnp.float32)
    T_L = jax.random.normal(k_tl, (B, S, D), jnp.float32)
    params = init_params(k_p, D)

    out = jax.block_until_ready(
        cross_feature_enhancement(T_V, T_L, params, num_heads=NUM_HEADS))
    ref = jax.block_until_ready(_reference(T_V, T_L, params, num_heads=NUM_HEADS))
    np.testing.assert_allclose(np.asarray(out), np.asarray(ref), rtol=2e-2, atol=2e-2)

    print("KERNEL_OK")
</pallas_src>

<mosaic_0001>
module attributes {stable_mosaic.version = 11 : i64} {
  func.func @_cfe_kernel(%arg0: i32, %arg1: memref<4xf32, #tpu.memory_space<smem>>, %arg2: memref<16x32xf32, #tpu.memory_space<vmem>>, %arg3: memref<16x32xf32, #tpu.memory_space<vmem>>, %arg4: memref<8x32xf32, #tpu.memory_space<vmem>>, %arg5: memref<32x32xbf16, #tpu.memory_space<vmem>>, %arg6: memref<1x32xf32, #tpu.memory_space<vmem>>, %arg7: memref<32x32xbf16, #tpu.memory_space<vmem>>, %arg8: memref<1x32xf32, #tpu.memory_space<vmem>>, %arg9: memref<32x32xbf16, #tpu.memory_space<vmem>>, %arg10: memref<1x32xf32, #tpu.memory_space<vmem>>, %arg11: memref<32x32xbf16, #tpu.memory_space<vmem>>, %arg12: memref<1x32xf32, #tpu.memory_space<vmem>>, %arg13: memref<32x128xbf16, #tpu.memory_space<vmem>>, %arg14: memref<1x128xf32, #tpu.memory_space<vmem>>, %arg15: memref<128x32xbf16, #tpu.memory_space<vmem>>, %arg16: memref<1x32xf32, #tpu.memory_space<vmem>>, %arg17: memref<16x32xf32, #tpu.memory_space<vmem>>) attributes {dimension_semantics = [#tpu.dimension_semantics<parallel>], iteration_bounds = array<i64: 1>, scalar_prefetch = 0 : i64, scratch_operands = 0 : i64, tpu.core_type = #tpu.core_type<tc>, window_params = [{transform_indices = @transform_0, window_bounds = array<i64: 4>}, {transform_indices = @transform_1, window_bounds = array<i64: 16, 32>}, {transform_indices = @transform_2, window_bounds = array<i64: 16, 32>}, {pipeline_mode = #tpu.pipeline_mode<synchronous>, transform_indices = @transform_3, window_bounds = array<i64: 8, 32>}, {pipeline_mode = #tpu.pipeline_mode<synchronous>, transform_indices = @transform_4, window_bounds = array<i64: 32, 32>}, {pipeline_mode = #tpu.pipeline_mode<synchronous>, transform_indices = @transform_5, window_bounds = array<i64: 1, 32>}, {pipeline_mode = #tpu.pipeline_mode<synchronous>, transform_indices = @transform_6, window_bounds = array<i64: 32, 32>}, {pipeline_mode = #tpu.pipeline_mode<synchronous>, transform_indices = @transform_7, window_bounds = array<i64: 1, 32>}, {pipeline_mode = #tpu.pipeline_mode<synchronous>, transform_indices = @transform_8, window_bounds = array<i64: 32, 32>}, {pipeline_mode = #tpu.pipeline_mode<synchronous>, transform_indices = @transform_9, window_bounds = array<i64: 1, 32>}, {pipeline_mode = #tpu.pipeline_mode<synchronous>, transform_indices = @transform_10, window_bounds = array<i64: 32, 32>}, {pipeline_mode = #tpu.pipeline_mode<synchronous>, transform_indices = @transform_11, window_bounds = array<i64: 1, 32>}, {pipeline_mode = #tpu.pipeline_mode<synchronous>, transform_indices = @transform_12, window_bounds = array<i64: 32, 128>}, {pipeline_mode = #tpu.pipeline_mode<synchronous>, transform_indices = @transform_13, window_bounds = array<i64: 1, 128>}, {pipeline_mode = #tpu.pipeline_mode<synchronous>, transform_indices = @transform_14, window_bounds = array<i64: 128, 32>}, {pipeline_mode = #tpu.pipeline_mode<synchronous>, transform_indices = @transform_15, window_bounds = array<i64: 1, 32>}, {transform_indices = @transform_16, window_bounds = array<i64: 16, 32>}]} {
    %c0 = arith.constant 0 : index
    %c0_0 = arith.constant 0 : index
    %0 = vector.load %arg3[%c0, %c0_0] : memref<16x32xf32, #tpu.memory_space<vmem>>, vector<16x32xf32>
    %c0_1 = arith.constant 0 : index
    %c0_2 = arith.constant 0 : index
    %1 = vector.load %arg2[%c0_1, %c0_2] : memref<16x32xf32, #tpu.memory_space<vmem>>, vector<16x32xf32>
    %2 = arith.truncf %1 : vector<16x32xf32> to vector<16x32xbf16>
    %3 = arith.truncf %0 : vector<16x32xf32> to vector<16x32xbf16>
    %c0_3 = arith.constant 0 : index
    %c0_4 = arith.constant 0 : index
    %4 = vector.load %arg5[%c0_3, %c0_4] : memref<32x32xbf16, #tpu.memory_space<vmem>>, vector<32x32xbf16>
    %cst = arith.constant dense<0.000000e+00> : vector<16x32xf32>
    %5 = tpu.matmul %2, %4, %cst {dimension_numbers = #tpu.dot_dimension_numbers<[1], [0], [0], [1], [0, 0, 1, 1], [], []>} : vector<16x32xbf16>, vector<32x32xbf16>, vector<16x32xf32> -> vector<16x32xf32>
    %c0_5 = arith.constant 0 : index
    %c0_6 = arith.constant 0 : index
    %6 = vector.load %arg6[%c0_5, %c0_6] : memref<1x32xf32, #tpu.memory_space<vmem>>, vector<1x32xf32>
    %7 = vector.broadcast %6 : vector<1x32xf32> to vector<16x32xf32>
    %8 = arith.addf %5, %7 : vector<16x32xf32>
    %c0_7 = arith.constant 0 : index
    %c0_8 = arith.constant 0 : index
    %9 = vector.load %arg7[%c0_7, %c0_8] : memref<32x32xbf16, #tpu.memory_space<vmem>>, vector<32x32xbf16>
    %cst_9 = arith.constant dense<0.000000e+00> : vector<16x32xf32>
    %10 = tpu.matmul %3, %9, %cst_9 {dimension_numbers = #tpu.dot_dimension_numbers<[1], [0], [0], [1], [0, 0, 1, 1], [], []>} : vector<16x32xbf16>, vector<32x32xbf16>, vector<16x32xf32> -> vector<16x32xf32>
    %c0_10 = arith.constant 0 : index
    %c0_11 = arith.constant 0 : index
    %11 = vector.load %arg8[%c0_10, %c0_11] : memref<1x32xf32, #tpu.memory_space<vmem>>, vector<1x32xf32>
    %12 = vector.broadcast %11 : vector<1x32xf32> to vector<16x32xf32>
    %13 = arith.addf %10, %12 : vector<16x32xf32>
    %c0_12 = arith.constant 0 : index
    %c0_13 = arith.constant 0 : index
    %14 = vector.load %arg9[%c0_12, %c0_13] : memref<32x32xbf16, #tpu.memory_space<vmem>>, vector<32x32xbf16>
    %cst_14 = arith.constant dense<0.000000e+00> : vector<16x32xf32>
    %15 = tpu.matmul %3, %14, %cst_14 {dimension_numbers = #tpu.dot_dimension_numbers<[1], [0], [0], [1], [0, 0, 1, 1], [], []>} : vector<16x32xbf16>, vector<32x32xbf16>, vector<16x32xf32> -> vector<16x32xf32>
    %c0_15 = arith.constant 0 : index
    %c0_16 = arith.constant 0 : index
    %16 = vector.load %arg10[%c0_15, %c0_16] : memref<1x32xf32, #tpu.memory_space<vmem>>, vector<1x32xf32>
    %17 = vector.broadcast %16 : vector<1x32xf32> to vector<16x32xf32>
    %18 = arith.addf %15, %17 : vector<16x32xf32>
    %c0_17 = arith.constant 0 : index
    %c0_18 = arith.constant 0 : index
    %19 = vector.load %arg4[%c0_17, %c0_18] : memref<8x32xf32, #tpu.memory_space<vmem>>, vector<8x32xf32>
    %20 = vector.shape_cast %8 : vector<16x32xf32> to vector<2x1x8x32xf32>
    %21 = vector.shape_cast %20 : vector<2x1x8x32xf32> to vector<2x1x8x32xf32>
    %22 = vector.broadcast %21 : vector<2x1x8x32xf32> to vector<2x8x8x32xf32>
    %23 = vector.shape_cast %13 : vector<16x32xf32> to vector<2x1x8x32xf32>
    %24 = vector.shape_cast %19 : vector<8x32xf32> to vector<1x8x1x32xf32>
    %25 = vector.broadcast %23 : vector<2x1x8x32xf32> to vector<2x8x8x32xf32>
    %26 = vector.broadcast %24 : vector<1x8x1x32xf32> to vector<2x8x8x32xf32>
    %27 = arith.mulf %25, %26 : vector<2x8x8x32xf32>
    %28 = vector.shape_cast %18 : vector<16x32xf32> to vector<2x1x8x32xf32>
    %29 = vector.shape_cast %19 : vector<8x32xf32> to vector<1x8x1x32xf32>
    %30 = vector.broadcast %28 : vector<2x1x8x32xf32> to vector<2x8x8x32xf32>
    %31 = vector.broadcast %29 : vector<1x8x1x32xf32> to vector<2x8x8x32xf32>
    %32 = arith.mulf %30, %31 : vector<2x8x8x32xf32>
    %33 = vector.shape_cast %22 : vector<2x8x8x32xf32> to vector<16x8x32xf32>
    %34 = arith.truncf %33 : vector<16x8x32xf32> to vector<16x8x32xbf16>
    %35 = vector.shape_cast %27 : vector<2x8x8x32xf32> to vector<16x8x32xf32>
    %36 = arith.truncf %35 : vector<16x8x32xf32> to vector<16x8x32xbf16>
    %37 = vector.shape_cast %32 : vector<2x8x8x32xf32> to vector<16x8x32xf32>
    %38 = arith.truncf %37 : vector<16x8x32xf32> to vector<16x8x32xbf16>
    "tpu.trace_start"() <{level = 10 : i32, message = "bqd,bkd->bqk"}> : () -> ()
    %cst_19 = arith.constant dense<0.000000e+00> : vector<16x8x8xf32>
    %39 = tpu.matmul %34, %36, %cst_19 {dimension_numbers = #tpu.dot_dimension_numbers<[2], [2], [1], [1], [0, 0, 0, 1, 1, 1], [0], [0]>} : vector<16x8x32xbf16>, vector<16x8x32xbf16>, vector<16x8x8xf32> -> vector<16x8x8xf32>
    "tpu.trace_stop"() : () -> ()
    %cst_20 = arith.constant dense<0xFF800000> : vector<16x8xf32>
    %40 = vector.multi_reduction <maximumf>, %39, %cst_20 [2] : vector<16x8x8xf32> to vector<16x8xf32>
    %41 = vector.shape_cast %40 : vector<16x8xf32> to vector<16x8x1xf32>
    %42 = vector.broadcast %41 : vector<16x8x1xf32> to vector<16x8x8xf32>
    %43 = arith.subf %39, %42 : vector<16x8x8xf32>
    %44 = math.exp %43 : vector<16x8x8xf32>
    %cst_21 = arith.constant dense<0.000000e+00> : vector<16x8xf32>
    %45 = vector.multi_reduction <add>, %44, %cst_21 [2] : vector<16x8x8xf32> to vector<16x8xf32>
    %46 = vector.shape_cast %45 : vector<16x8xf32> to vector<16x8x1xf32>
    %47 = tpu.reciprocal %46 {approx = true} : vector<16x8x1xf32> -> vector<16x8x1xf32>
    %48 = vector.broadcast %47 : vector<16x8x1xf32> to vector<16x8x8xf32>
    %49 = arith.mulf %44, %48 : vector<16x8x8xf32>
    %50 = arith.truncf %49 : vector<16x8x8xf32> to vector<16x8x8xbf16>
    "tpu.trace_start"() <{level = 10 : i32, message = "bqk,bkd->bqd"}> : () -> ()
    %cst_22 = arith.constant dense<0.000000e+00> : vector<16x8x32xf32>
    %51 = tpu.matmul %50, %38, %cst_22 {dimension_numbers = #tpu.dot_dimension_numbers<[2], [1], [1], [2], [0, 0, 0, 1, 1, 2], [0], [0]>} : vector<16x8x8xbf16>, vector<16x8x32xbf16>, vector<16x8x32xf32> -> vector<16x8x32xf32>
    "tpu.trace_stop"() : () -> ()
    %52 = vector.shape_cast %51 : vector<16x8x32xf32> to vector<2x8x8x32xf32>
    %cst_23 = arith.constant dense<0.000000e+00> : vector<2x8x32xf32>
    %53 = vector.multi_reduction <add>, %52, %cst_23 [1] : vector<2x8x8x32xf32> to vector<2x8x32xf32>
    %54 = vector.shape_cast %53 : vector<2x8x32xf32> to vector<16x32xf32>
    %55 = arith.truncf %54 : vector<16x32xf32> to vector<16x32xbf16>
    %c0_24 = arith.constant 0 : index
    %c0_25 = arith.constant 0 : index
    %56 = vector.load %arg11[%c0_24, %c0_25] : memref<32x32xbf16, #tpu.memory_space<vmem>>, vector<32x32xbf16>
    %cst_26 = arith.constant dense<0.000000e+00> : vector<16x32xf32>
    %57 = tpu.matmul %55, %56, %cst_26 {dimension_numbers = #tpu.dot_dimension_numbers<[1], [0], [0], [1], [0, 0, 1, 1], [], []>} : vector<16x32xbf16>, vector<32x32xbf16>, vector<16x32xf32> -> vector<16x32xf32>
    %c0_27 = arith.constant 0 : index
    %c0_28 = arith.constant 0 : index
    %58 = vector.load %arg12[%c0_27, %c0_28] : memref<1x32xf32, #tpu.memory_space<vmem>>, vector<1x32xf32>
    %59 = vector.broadcast %58 : vector<1x32xf32> to vector<16x32xf32>
    %60 = arith.addf %57, %59 : vector<16x32xf32>
    %c0_29 = arith.constant 0 : index
    %61 = memref.load %arg1[%c0_29] : memref<4xf32, #tpu.memory_space<smem>>
    %c1 = arith.constant 1 : index
    %62 = memref.load %arg1[%c1] : memref<4xf32, #tpu.memory_space<smem>>
    %c2 = arith.constant 2 : index
    %63 = memref.load %arg1[%c2] : memref<4xf32, #tpu.memory_space<smem>>
    %c3 = arith.constant 3 : index
    %64 = memref.load %arg1[%c3] : memref<4xf32, #tpu.memory_space<smem>>
    %65 = vector.broadcast %61 : f32 to vector<16x32xf32>
    %66 = arith.mulf %65, %60 : vector<16x32xf32>
    %67 = vector.broadcast %62 : f32 to vector<16x32xf32>
    %68 = arith.mulf %67, %0 : vector<16x32xf32>
    %69 = arith.addf %66, %68 : vector<16x32xf32>
    %70 = arith.truncf %69 : vector<16x32xf32> to vector<16x32xbf16>
    %cst_30 = arith.constant 0.000000e+00 : f32
    %71 = vector.broadcast %cst_30 : f32 to vector<16x32xf32>
    %c0_31 = arith.constant 0 : index
    %c0_32 = arith.constant 0 : index
    %72 = vector.load %arg13[%c0_31, %c0_32] : memref<32x128xbf16, #tpu.memory_space<vmem>>, vector<32x128xbf16>
    %cst_33 = arith.constant dense<0.000000e+00> : vector<16x128xf32>
    %73 = tpu.matmul %70, %72, %cst_33 {dimension_numbers = #tpu.dot_dimension_numbers<[1], [0], [0], [1], [0, 0, 1, 1], [], []>} : vector<16x32xbf16>, vector<32x128xbf16>, vector<16x128xf32> -> vector<16x128xf32>
    %c0_34 = arith.constant 0 : index
    %c0_35 = arith.constant 0 : index
    %74 = vector.load %arg14[%c0_34, %c0_35] : memref<1x128xf32, #tpu.memory_space<vmem>>, vector<1x128xf32>
    %75 = vector.broadcast %74 : vector<1x128xf32> to vector<16x128xf32>
    %76 = arith.addf %73, %75 : vector<16x128xf32>
    %cst_36 = arith.constant 0.000000e+00 : f32
    %77 = vector.broadcast %cst_36 : f32 to vector<16x128xf32>
    %78 = arith.maximumf %76, %77 : vector<16x128xf32>
    %79 = arith.truncf %78 : vector<16x128xf32> to vector<16x128xbf16>
    %c0_37 = arith.constant 0 : index
    %c0_38 = arith.constant 0 : index
    %80 = vector.load %arg15[%c0_37, %c0_38] : memref<128x32xbf16, #tpu.memory_space<vmem>>, vector<128x32xbf16>
    %cst_39 = arith.constant dense<0.000000e+00> : vector<16x32xf32>
    %81 = tpu.matmul %79, %80, %cst_39 {dimension_numbers = #tpu.dot_dimension_numbers<[1], [0], [0], [1], [0, 0, 1, 1], [], []>} : vector<16x128xbf16>, vector<128x32xbf16>, vector<16x32xf32> -> vector<16x32xf32>
    %82 = arith.addf %71, %81 : vector<16x32xf32>
    %c0_40 = arith.constant 0 : index
    %c0_41 = arith.constant 0 : index
    %83 = vector.load %arg16[%c0_40, %c0_41] : memref<1x32xf32, #tpu.memory_space<vmem>>, vector<1x32xf32>
    %84 = vector.broadcast %83 : vector<1x32xf32> to vector<16x32xf32>
    %85 = arith.addf %82, %84 : vector<16x32xf32>
    %86 = vector.broadcast %63 : f32 to vector<16x32xf32>
    %87 = arith.mulf %86, %69 : vector<16x32xf32>
    %88 = vector.broadcast %64 : f32 to vector<16x32xf32>
    %89 = arith.mulf %88, %85 : vector<16x32xf32>
    %90 = arith.addf %87, %89 : vector<16x32xf32>
    %c0_42 = arith.constant 0 : index
    %c0_43 = arith.constant 0 : index
    %91 = vector.load %arg17[%c0_42, %c0_43] : memref<16x32xf32, #tpu.memory_space<vmem>>, vector<16x32xf32>
    tpu.vector_store %arg17[%c0_42, %c0_43], %90 {strides = array<i32>} : memref<16x32xf32, #tpu.memory_space<vmem>>, vector<16x32xf32>,
    return
  }
  func.func @transform_0(%arg0: i32) -> i32 {
    %c0_i32 = arith.constant 0 : i32
    %c0_i32_0 = arith.constant 0 : i32
    return %c0_i32 : i32
  }
  func.func @transform_1(%arg0: i32) -> (i32, i32) {
    %c0_i32 = arith.constant 0 : i32
    %c0_i32_0 = arith.constant 0 : i32
    return %arg0, %c0_i32 : i32, i32
  }
  func.func @transform_2(%arg0: i32) -> (i32, i32) {
    %c0_i32 = arith.constant 0 : i32
    %c0_i32_0 = arith.constant 0 : i32
    return %arg0, %c0_i32 : i32, i32
  }
  func.func @transform_3(%arg0: i32) -> (i32, i32) {
    %c0_i32 = arith.constant 0 : i32
    %c0_i32_0 = arith.constant 0 : i32
    %c0_i32_1 = arith.constant 0 : i32
    return %c0_i32, %c0_i32_0 : i32, i32
  }
  func.func @transform_4(%arg0: i32) -> (i32, i32) {
    %c0_i32 = arith.constant 0 : i32
    %c0_i32_0 = arith.constant 0 : i32
    %c0_i32_1 = arith.constant 0 : i32
    return %c0_i32, %c0_i32_0 : i32, i32
  }
  func.func @transform_5(%arg0: i32) -> (i32, i32) {
    %c0_i32 = arith.constant 0 : i32
    %c0_i32_0 = arith.constant 0 : i32
    %c0_i32_1 = arith.constant 0 : i32
    return %c0_i32, %c0_i32_0 : i32, i32
  }
  func.func @transform_6(%arg0: i32) -> (i32, i32) {
    %c0_i32 = arith.constant 0 : i32
    %c0_i32_0 = arith.constant 0 : i32
    %c0_i32_1 = arith.constant 0 : i32
    return %c0_i32, %c0_i32_0 : i32, i32
  }
  func.func @transform_7(%arg0: i32) -> (i32, i32) {
    %c0_i32 = arith.constant 0 : i32
    %c0_i32_0 = arith.constant 0 : i32
    %c0_i32_1 = arith.constant 0 : i32
    return %c0_i32, %c0_i32_0 : i32, i32
  }
  func.func @transform_8(%arg0: i32) -> (i32, i32) {
    %c0_i32 = arith.constant 0 : i32
    %c0_i32_0 = arith.constant 0 : i32
    %c0_i32_1 = arith.constant 0 : i32
    return %c0_i32, %c0_i32_0 : i32, i32
  }
  func.func @transform_9(%arg0: i32) -> (i32, i32) {
    %c0_i32 = arith.constant 0 : i32
    %c0_i32_0 = arith.constant 0 : i32
    %c0_i32_1 = arith.constant 0 : i32
    return %c0_i32, %c0_i32_0 : i32, i32
  }
  func.func @transform_10(%arg0: i32) -> (i32, i32) {
    %c0_i32 = arith.constant 0 : i32
    %c0_i32_0 = arith.constant 0 : i32
    %c0_i32_1 = arith.constant 0 : i32
    return %c0_i32, %c0_i32_0 : i32, i32
  }
  func.func @transform_11(%arg0: i32) -> (i32, i32) {
    %c0_i32 = arith.constant 0 : i32
    %c0_i32_0 = arith.constant 0 : i32
    %c0_i32_1 = arith.constant 0 : i32
    return %c0_i32, %c0_i32_0 : i32, i32
  }
  func.func @transform_12(%arg0: i32) -> (i32, i32) {
    %c0_i32 = arith.constant 0 : i32
    %c0_i32_0 = arith.constant 0 : i32
    %c0_i32_1 = arith.constant 0 : i32
    return %c0_i32, %c0_i32_0 : i32, i32
  }
  func.func @transform_13(%arg0: i32) -> (i32, i32) {
    %c0_i32 = arith.constant 0 : i32
    %c0_i32_0 = arith.constant 0 : i32
    %c0_i32_1 = arith.constant 0 : i32
    return %c0_i32, %c0_i32_0 : i32, i32
  }
  func.func @transform_14(%arg0: i32) -> (i32, i32) {
    %c0_i32 = arith.constant 0 : i32
    %c0_i32_0 = arith.constant 0 : i32
    %c0_i32_1 = arith.constant 0 : i32
    return %c0_i32, %c0_i32_0 : i32, i32
  }
  func.func @transform_15(%arg0: i32) -> (i32, i32) {
    %c0_i32 = arith.constant 0 : i32
    %c0_i32_0 = arith.constant 0 : i32
    %c0_i32_1 = arith.constant 0 : i32
    return %c0_i32, %c0_i32_0 : i32, i32
  }
  func.func @transform_16(%arg0: i32) -> (i32, i32) {
    %c0_i32 = arith.constant 0 : i32
    %c0_i32_0 = arith.constant 0 : i32
    return %arg0, %c0_i32 : i32, i32
  }
}

module attributes {stable_mosaic.version = 11 : i64} {
  func.func @_cfe_kernel(%arg0: i32, %arg1: memref<4xf32, #tpu.memory_space<smem>>, %arg2: memref<16x32xf32, #tpu.memory_space<vmem>>, %arg3: memref<16x32xf32, #tpu.memory_space<vmem>>, %arg4: memref<8x32xf32, #tpu.memory_space<vmem>>, %arg5: memref<32x32xbf16, #tpu.memory_space<vmem>>, %arg6: memref<1x32xf32, #tpu.memory_space<vmem>>, %arg7: memref<32x32xbf16, #tpu.memory_space<vmem>>, %arg8: memref<1x32xf32, #tpu.memory_space<vmem>>, %arg9: memref<32x32xbf16, #tpu.memory_space<vmem>>, %arg10: memref<1x32xf32, #tpu.memory_space<vmem>>, %arg11: memref<32x32xbf16, #tpu.memory_space<vmem>>, %arg12: memref<1x32xf32, #tpu.memory_space<vmem>>, %arg13: memref<32x128xbf16, #tpu.memory_space<vmem>>, %arg14: memref<1x128xf32, #tpu.memory_space<vmem>>, %arg15: memref<128x32xbf16, #tpu.memory_space<vmem>>, %arg16: memref<1x32xf32, #tpu.memory_space<vmem>>, %arg17: memref<16x32xf32, #tpu.memory_space<vmem>>) attributes {dimension_semantics = [#tpu.dimension_semantics<parallel>], iteration_bounds = array<i64: 1>, scalar_prefetch = 0 : i64, scratch_operands = 0 : i64, tpu.core_type = #tpu.core_type<tc>, window_params = [{transform_indices = @transform_0, window_bounds = array<i64: 4>}, {transform_indices = @transform_1, window_bounds = array<i64: 16, 32>}, {transform_indices = @transform_2, window_bounds = array<i64: 16, 32>}, {pipeline_mode = #tpu.pipeline_mode<synchronous>, transform_indices = @transform_3, window_bounds = array<i64: 8, 32>}, {pipeline_mode = #tpu.pipeline_mode<synchronous>, transform_indices = @transform_4, window_bounds = array<i64: 32, 32>}, {pipeline_mode = #tpu.pipeline_mode<synchronous>, transform_indices = @transform_5, window_bounds = array<i64: 1, 32>}, {pipeline_mode = #tpu.pipeline_mode<synchronous>, transform_indices = @transform_6, window_bounds = array<i64: 32, 32>}, {pipeline_mode = #tpu.pipeline_mode<synchronous>, transform_indices = @transform_7, window_bounds = array<i64: 1, 32>}, {pipeline_mode = #tpu.pipeline_mode<synchronous>, transform_indices = @transform_8, window_bounds = array<i64: 32, 32>}, {pipeline_mode = #tpu.pipeline_mode<synchronous>, transform_indices = @transform_9, window_bounds = array<i64: 1, 32>}, {pipeline_mode = #tpu.pipeline_mode<synchronous>, transform_indices = @transform_10, window_bounds = array<i64: 32, 32>}, {pipeline_mode = #tpu.pipeline_mode<synchronous>, transform_indices = @transform_11, window_bounds = array<i64: 1, 32>}, {pipeline_mode = #tpu.pipeline_mode<synchronous>, transform_indices = @transform_12, window_bounds = array<i64: 32, 128>}, {pipeline_mode = #tpu.pipeline_mode<synchronous>, transform_indices = @transform_13, window_bounds = array<i64: 1, 128>}, {pipeline_mode = #tpu.pipeline_mode<synchronous>, transform_indices = @transform_14, window_bounds = array<i64: 128, 32>}, {pipeline_mode = #tpu.pipeline_mode<synchronous>, transform_indices = @transform_15, window_bounds = array<i64: 1, 32>}, {transform_indices = @transform_16, window_bounds = array<i64: 16, 32>}]} {
    %c0 = arith.constant 0 : index
    %c0_0 = arith.constant 0 : index
    %0 = vector.load %arg3[%c0, %c0_0] : memref<16x32xf32, #tpu.memory_space<vmem>>, vector<16x32xf32>
    %c0_1 = arith.constant 0 : index
    %c0_2 = arith.constant 0 : index
    %1 = vector.load %arg2[%c0_1, %c0_2] : memref<16x32xf32, #tpu.memory_space<vmem>>, vector<16x32xf32>
    %2 = arith.truncf %1 : vector<16x32xf32> to vector<16x32xbf16>
    %3 = arith.truncf %0 : vector<16x32xf32> to vector<16x32xbf16>
    %c0_3 = arith.constant 0 : index
    %c0_4 = arith.constant 0 : index
    %4 = vector.load %arg5[%c0_3, %c0_4] : memref<32x32xbf16, #tpu.memory_space<vmem>>, vector<32x32xbf16>
    %cst = arith.constant dense<0.000000e+00> : vector<16x32xf32>
    %5 = tpu.matmul %2, %4, %cst {dimension_numbers = #tpu.dot_dimension_numbers<[1], [0], [0], [1], [0, 0, 1, 1], [], []>} : vector<16x32xbf16>, vector<32x32xbf16>, vector<16x32xf32> -> vector<16x32xf32>
    %c0_5 = arith.constant 0 : index
    %c0_6 = arith.constant 0 : index
    %6 = vector.load %arg6[%c0_5, %c0_6] : memref<1x32xf32, #tpu.memory_space<vmem>>, vector<1x32xf32>
    %7 = vector.broadcast %6 : vector<1x32xf32> to vector<16x32xf32>
    %8 = arith.addf %5, %7 : vector<16x32xf32>
    %c0_7 = arith.constant 0 : index
    %c0_8 = arith.constant 0 : index
    %9 = vector.load %arg7[%c0_7, %c0_8] : memref<32x32xbf16, #tpu.memory_space<vmem>>, vector<32x32xbf16>
    %cst_9 = arith.constant dense<0.000000e+00> : vector<16x32xf32>
    %10 = tpu.matmul %3, %9, %cst_9 {dimension_numbers = #tpu.dot_dimension_numbers<[1], [0], [0], [1], [0, 0, 1, 1], [], []>} : vector<16x32xbf16>, vector<32x32xbf16>, vector<16x32xf32> -> vector<16x32xf32>
    %c0_10 = arith.constant 0 : index
    %c0_11 = arith.constant 0 : index
    %11 = vector.load %arg8[%c0_10, %c0_11] : memref<1x32xf32, #tpu.memory_space<vmem>>, vector<1x32xf32>
    %12 = vector.broadcast %11 : vector<1x32xf32> to vector<16x32xf32>
    %13 = arith.addf %10, %12 : vector<16x32xf32>
    %c0_12 = arith.constant 0 : index
    %c0_13 = arith.constant 0 : index
    %14 = vector.load %arg9[%c0_12, %c0_13] : memref<32x32xbf16, #tpu.memory_space<vmem>>, vector<32x32xbf16>
    %cst_14 = arith.constant dense<0.000000e+00> : vector<16x32xf32>
    %15 = tpu.matmul %3, %14, %cst_14 {dimension_numbers = #tpu.dot_dimension_numbers<[1], [0], [0], [1], [0, 0, 1, 1], [], []>} : vector<16x32xbf16>, vector<32x32xbf16>, vector<16x32xf32> -> vector<16x32xf32>
    %c0_15 = arith.constant 0 : index
    %c0_16 = arith.constant 0 : index
    %16 = vector.load %arg10[%c0_15, %c0_16] : memref<1x32xf32, #tpu.memory_space<vmem>>, vector<1x32xf32>
    %17 = vector.broadcast %16 : vector<1x32xf32> to vector<16x32xf32>
    %18 = arith.addf %15, %17 : vector<16x32xf32>
    %c0_17 = arith.constant 0 : index
    %c0_18 = arith.constant 0 : index
    %19 = vector.load %arg4[%c0_17, %c0_18] : memref<8x32xf32, #tpu.memory_space<vmem>>, vector<8x32xf32>
    %20 = vector.shape_cast %8 : vector<16x32xf32> to vector<2x1x8x32xf32>
    %21 = vector.shape_cast %20 : vector<2x1x8x32xf32> to vector<2x1x8x32xf32>
    %22 = vector.broadcast %21 : vector<2x1x8x32xf32> to vector<2x8x8x32xf32>
    %23 = vector.shape_cast %13 : vector<16x32xf32> to vector<2x1x8x32xf32>
    %24 = vector.shape_cast %19 : vector<8x32xf32> to vector<1x8x1x32xf32>
    %25 = vector.broadcast %23 : vector<2x1x8x32xf32> to vector<2x8x8x32xf32>
    %26 = vector.broadcast %24 : vector<1x8x1x32xf32> to vector<2x8x8x32xf32>
    %27 = arith.mulf %25, %26 : vector<2x8x8x32xf32>
    %28 = vector.shape_cast %18 : vector<16x32xf32> to vector<2x1x8x32xf32>
    %29 = vector.shape_cast %19 : vector<8x32xf32> to vector<1x8x1x32xf32>
    %30 = vector.broadcast %28 : vector<2x1x8x32xf32> to vector<2x8x8x32xf32>
    %31 = vector.broadcast %29 : vector<1x8x1x32xf32> to vector<2x8x8x32xf32>
    %32 = arith.mulf %30, %31 : vector<2x8x8x32xf32>
    %33 = vector.shape_cast %22 : vector<2x8x8x32xf32> to vector<16x8x32xf32>
    %34 = arith.truncf %33 : vector<16x8x32xf32> to vector<16x8x32xbf16>
    %35 = vector.shape_cast %27 : vector<2x8x8x32xf32> to vector<16x8x32xf32>
    %36 = arith.truncf %35 : vector<16x8x32xf32> to vector<16x8x32xbf16>
    %37 = vector.shape_cast %32 : vector<2x8x8x32xf32> to vector<16x8x32xf32>
    %38 = arith.truncf %37 : vector<16x8x32xf32> to vector<16x8x32xbf16>
    "tpu.trace_start"() <{level = 10 : i32, message = "bqd,bkd->bqk"}> : () -> ()
    %cst_19 = arith.constant dense<0.000000e+00> : vector<16x8x8xf32>
    %39 = tpu.matmul %34, %36, %cst_19 {dimension_numbers = #tpu.dot_dimension_numbers<[2], [2], [1], [1], [0, 0, 0, 1, 1, 1], [0], [0]>} : vector<16x8x32xbf16>, vector<16x8x32xbf16>, vector<16x8x8xf32> -> vector<16x8x8xf32>
    "tpu.trace_stop"() : () -> ()
    %cst_20 = arith.constant dense<0xFF800000> : vector<16x8xf32>
    %40 = vector.multi_reduction <maximumf>, %39, %cst_20 [2] : vector<16x8x8xf32> to vector<16x8xf32>
    %41 = vector.shape_cast %40 : vector<16x8xf32> to vector<16x8x1xf32>
    %42 = vector.broadcast %41 : vector<16x8x1xf32> to vector<16x8x8xf32>
    %43 = arith.subf %39, %42 : vector<16x8x8xf32>
    %44 = math.exp %43 : vector<16x8x8xf32>
    %cst_21 = arith.constant dense<0.000000e+00> : vector<16x8xf32>
    %45 = vector.multi_reduction <add>, %44, %cst_21 [2] : vector<16x8x8xf32> to vector<16x8xf32>
    %46 = vector.shape_cast %45 : vector<16x8xf32> to vector<16x8x1xf32>
    %47 = tpu.reciprocal %46 {approx = true} : vector<16x8x1xf32> -> vector<16x8x1xf32>
    %48 = vector.broadcast %47 : vector<16x8x1xf32> to vector<16x8x8xf32>
    %49 = arith.mulf %44, %48 : vector<16x8x8xf32>
    %50 = arith.truncf %49 : vector<16x8x8xf32> to vector<16x8x8xbf16>
    "tpu.trace_start"() <{level = 10 : i32, message = "bqk,bkd->bqd"}> : () -> ()
    %cst_22 = arith.constant dense<0.000000e+00> : vector<16x8x32xf32>
    %51 = tpu.matmul %50, %38, %cst_22 {dimension_numbers = #tpu.dot_dimension_numbers<[2], [1], [1], [2], [0, 0, 0, 1, 1, 2], [0], [0]>} : vector<16x8x8xbf16>, vector<16x8x32xbf16>, vector<16x8x32xf32> -> vector<16x8x32xf32>
    "tpu.trace_stop"() : () -> ()
    %52 = vector.shape_cast %51 : vector<16x8x32xf32> to vector<2x8x8x32xf32>
    %cst_23 = arith.constant dense<0.000000e+00> : vector<2x8x32xf32>
    %53 = vector.multi_reduction <add>, %52, %cst_23 [1] : vector<2x8x8x32xf32> to vector<2x8x32xf32>
    %54 = vector.shape_cast %53 : vector<2x8x32xf32> to vector<16x32xf32>
    %55 = arith.truncf %54 : vector<16x32xf32> to vector<16x32xbf16>
    %c0_24 = arith.constant 0 : index
    %c0_25 = arith.constant 0 : index
    %56 = vector.load %arg11[%c0_24, %c0_25] : memref<32x32xbf16, #tpu.memory_space<vmem>>, vector<32x32xbf16>
    %cst_26 = arith.constant dense<0.000000e+00> : vector<16x32xf32>
    %57 = tpu.matmul %55, %56, %cst_26 {dimension_numbers = #tpu.dot_dimension_numbers<[1], [0], [0], [1], [0, 0, 1, 1], [], []>} : vector<16x32xbf16>, vector<32x32xbf16>, vector<16x32xf32> -> vector<16x32xf32>
    %c0_27 = arith.constant 0 : index
    %c0_28 = arith.constant 0 : index
    %58 = vector.load %arg12[%c0_27, %c0_28] : memref<1x32xf32, #tpu.memory_space<vmem>>, vector<1x32xf32>
    %59 = vector.broadcast %58 : vector<1x32xf32> to vector<16x32xf32>
    %60 = arith.addf %57, %59 : vector<16x32xf32>
    %c0_29 = arith.constant 0 : index
    %61 = memref.load %arg1[%c0_29] : memref<4xf32, #tpu.memory_space<smem>>
    %c1 = arith.constant 1 : index
    %62 = memref.load %arg1[%c1] : memref<4xf32, #tpu.memory_space<smem>>
    %c2 = arith.constant 2 : index
    %63 = memref.load %arg1[%c2] : memref<4xf32, #tpu.memory_space<smem>>
    %c3 = arith.constant 3 : index
    %64 = memref.load %arg1[%c3] : memref<4xf32, #tpu.memory_space<smem>>
    %65 = vector.broadcast %61 : f32 to vector<16x32xf32>
    %66 = arith.mulf %65, %60 : vector<16x32xf32>
    %67 = vector.broadcast %62 : f32 to vector<16x32xf32>
    %68 = arith.mulf %67, %0 : vector<16x32xf32>
    %69 = arith.addf %66, %68 : vector<16x32xf32>
    %70 = arith.truncf %69 : vector<16x32xf32> to vector<16x32xbf16>
    %cst_30 = arith.constant 0.000000e+00 : f32
    %71 = vector.broadcast %cst_30 : f32 to vector<16x32xf32>
    %c0_31 = arith.constant 0 : index
    %c0_32 = arith.constant 0 : index
    %72 = vector.load %arg13[%c0_31, %c0_32] : memref<32x128xbf16, #tpu.memory_space<vmem>>, vector<32x128xbf16>
    %cst_33 = arith.constant dense<0.000000e+00> : vector<16x128xf32>
    %73 = tpu.matmul %70, %72, %cst_33 {dimension_numbers = #tpu.dot_dimension_numbers<[1], [0], [0], [1], [0, 0, 1, 1], [], []>} : vector<16x32xbf16>, vector<32x128xbf16>, vector<16x128xf32> -> vector<16x128xf32>
    %c0_34 = arith.constant 0 : index
    %c0_35 = arith.constant 0 : index
    %74 = vector.load %arg14[%c0_34, %c0_35] : memref<1x128xf32, #tpu.memory_space<vmem>>, vector<1x128xf32>
    %75 = vector.broadcast %74 : vector<1x128xf32> to vector<16x128xf32>
    %76 = arith.addf %73, %75 : vector<16x128xf32>
    %cst_36 = arith.constant 0.000000e+00 : f32
    %77 = vector.broadcast %cst_36 : f32 to vector<16x128xf32>
    %78 = arith.maximumf %76, %77 : vector<16x128xf32>
    %79 = arith.truncf %78 : vector<16x128xf32> to vector<16x128xbf16>
    %c0_37 = arith.constant 0 : index
    %c0_38 = arith.constant 0 : index
    %80 = vector.load %arg15[%c0_37, %c0_38] : memref<128x32xbf16, #tpu.memory_space<vmem>>, vector<128x32xbf16>
    %cst_39 = arith.constant dense<0.000000e+00> : vector<16x32xf32>
    %81 = tpu.matmul %79, %80, %cst_39 {dimension_numbers = #tpu.dot_dimension_numbers<[1], [0], [0], [1], [0, 0, 1, 1], [], []>} : vector<16x128xbf16>, vector<128x32xbf16>, vector<16x32xf32> -> vector<16x32xf32>
    %82 = arith.addf %71, %81 : vector<16x32xf32>
    %c0_40 = arith.constant 0 : index
    %c0_41 = arith.constant 0 : index
    %83 = vector.load %arg16[%c0_40, %c0_41] : memref<1x32xf32, #tpu.memory_space<vmem>>, vector<1x32xf32>
    %84 = vector.broadcast %83 : vector<1x32xf32> to vector<16x32xf32>
    %85 = arith.addf %82, %84 : vector<16x32xf32>
    %86 = vector.broadcast %63 : f32 to vector<16x32xf32>
    %87 = arith.mulf %86, %69 : vector<16x32xf32>
    %88 = vector.broadcast %64 : f32 to vector<16x32xf32>
    %89 = arith.mulf %88, %85 : vector<16x32xf32>
    %90 = arith.addf %87, %89 : vector<16x32xf32>
    %c0_42 = arith.constant 0 : index
    %c0_43 = arith.constant 0 : index
    %91 = vector.load %arg17[%c0_42, %c0_43] : memref<16x32xf32, #tpu.memory_space<vmem>>, vector<16x32xf32>
    tpu.vector_store %arg17[%c0_42, %c0_43], %90 {strides = array<i32>} : memref<16x32xf32, #tpu.memory_space<vmem>>, vector<16x32xf32>,
    return
  }
  func.func @transform_0(%arg0: i32) -> i32 {
    %c0_i32 = arith.constant 0 : i32
    %c0_i32_0 = arith.constant 0 : i32
    return %c0_i32 : i32
  }
  func.func @transform_1(%arg0: i32) -> (i32, i32) {
    %c0_i32 = arith.constant 0 : i32
    %c0_i32_0 = arith.constant 0 : i32
    return %arg0, %c0_i32 : i32, i32
  }
  func.func @transform_2(%arg0: i32) -> (i32, i32) {
    %c0_i32 = arith.constant 0 : i32
    %c0_i32_0 = arith.constant 0 : i32
    return %arg0, %c0_i32 : i32, i32
  }
  func.func @transform_3(%arg0: i32) -> (i32, i32) {
    %c0_i32 = arith.constant 0 : i32
    %c0_i32_0 = arith.constant 0 : i32
    %c0_i32_1 = arith.constant 0 : i32
    return %c0_i32, %c0_i32_0 : i32, i32
  }
  func.func @transform_4(%arg0: i32) -> (i32, i32) {
    %c0_i32 = arith.constant 0 : i32
    %c0_i32_0 = arith.constant 0 : i32
    %c0_i32_1 = arith.constant 0 : i32
    return %c0_i32, %c0_i32_0 : i32, i32
  }
  func.func @transform_5(%arg0: i32) -> (i32, i32) {
    %c0_i32 = arith.constant 0 : i32
    %c0_i32_0 = arith.constant 0 : i32
    %c0_i32_1 = arith.constant 0 : i32
    return %c0_i32, %c0_i32_0 : i32, i32
  }
  func.func @transform_6(%arg0: i32) -> (i32, i32) {
    %c0_i32 = arith.constant 0 : i32
    %c0_i32_0 = arith.constant 0 : i32
    %c0_i32_1 = arith.constant 0 : i32
    return %c0_i32, %c0_i32_0 : i32, i32
  }
  func.func @transform_7(%arg0: i32) -> (i32, i32) {
    %c0_i32 = arith.constant 0 : i32
    %c0_i32_0 = arith.constant 0 : i32
    %c0_i32_1 = arith.constant 0 : i32
    return %c0_i32, %c0_i32_0 : i32, i32
  }
  func.func @transform_8(%arg0: i32) -> (i32, i32) {
    %c0_i32 = arith.constant 0 : i32
    %c0_i32_0 = arith.constant 0 : i32
    %c0_i32_1 = arith.constant 0 : i32
    return %c0_i32, %c0_i32_0 : i32, i32
  }
  func.func @transform_9(%arg0: i32) -> (i32, i32) {
    %c0_i32 = arith.constant 0 : i32
    %c0_i32_0 = arith.constant 0 : i32
    %c0_i32_1 = arith.constant 0 : i32
    return %c0_i32, %c0_i32_0 : i32, i32
  }
  func.func @transform_10(%arg0: i32) -> (i32, i32) {
    %c0_i32 = arith.constant 0 : i32
    %c0_i32_0 = arith.constant 0 : i32
    %c0_i32_1 = arith.constant 0 : i32
    return %c0_i32, %c0_i32_0 : i32, i32
  }
  func.func @transform_11(%arg0: i32) -> (i32, i32) {
    %c0_i32 = arith.constant 0 : i32
    %c0_i32_0 = arith.constant 0 : i32
    %c0_i32_1 = arith.constant 0 : i32
    return %c0_i32, %c0_i32_0 : i32, i32
  }
  func.func @transform_12(%arg0: i32) -> (i32, i32) {
    %c0_i32 = arith.constant 0 : i32
    %c0_i32_0 = arith.constant 0 : i32
    %c0_i32_1 = arith.constant 0 : i32
    return %c0_i32, %c0_i32_0 : i32, i32
  }
  func.func @transform_13(%arg0: i32) -> (i32, i32) {
    %c0_i32 = arith.constant 0 : i32
    %c0_i32_0 = arith.constant 0 : i32
    %c0_i32_1 = arith.constant 0 : i32
    return %c0_i32, %c0_i32_0 : i32, i32
  }
  func.func @transform_14(%arg0: i32) -> (i32, i32) {
    %c0_i32 = arith.constant 0 : i32
    %c0_i32_0 = arith.constant 0 : i32
    %c0_i32_1 = arith.constant 0 : i32
    return %c0_i32, %c0_i32_0 : i32, i32
  }
  func.func @transform_15(%arg0: i32) -> (i32, i32) {
    %c0_i32 = arith.constant 0 : i32
    %c0_i32_0 = arith.constant 0 : i32
    %c0_i32_1 = arith.constant 0 : i32
    return %c0_i32, %c0_i32_0 : i32, i32
  }
  func.func @transform_16(%arg0: i32) -> (i32, i32) {
    %c0_i32 = arith.constant 0 : i32
    %c0_i32_0 = arith.constant 0 : i32
    return %arg0, %c0_i32 : i32, i32
  }
}

</mosaic_0001>

<bundles_post_ra>
// kernel: tpu_custom_call.1
= control target key start
LH: loop header
LB: loop body
LE: loop exit
PB: predicated region body
PF: predicated region fallthrough
CT: control target
= control target key end

     0   :  { %s2153_s0 = inlined_call_operand.hbm [shape: f32[4], index: 0, kind: input, shape index: {}]   ;;  %s2154_s1 = inlined_call_operand.vmem [shape: f32[16,32], index: 1, kind: input, shape index: {}]   ;;  %s2155_s2 = inlined_call_operand.vmem [shape: f32[16,32], index: 2, kind: input, shape index: {}]   ;;  %s2156_s3 = inlined_call_operand.hbm [shape: f32[8,32], index: 3, kind: input, shape index: {}]   ;;  %s2157_s4 = inlined_call_operand.vmem [shape: bf16[32,32], index: 4, kind: input, shape index: {}]   ;;  %s2158_s5 = inlined_call_operand.vmem [shape: f32[1,32], index: 5, kind: input, shape index: {}]   ;;  %s2159_s6 = inlined_call_operand.vmem [shape: bf16[32,32], index: 6, kind: input, shape index: {}]   ;;  %s2160_s7 = inlined_call_operand.vmem [shape: f32[1,32], index: 7, kind: input, shape index: {}]   ;;  %s2161_s8 = inlined_call_operand.vmem [shape: bf16[32,32], index: 8, kind: input, shape index: {}]   ;;  %s2162_s9 = inlined_call_operand.vmem [shape: f32[1,32], index: 9, kind: input, shape index: {}]   ;;  %s2163_s10 = inlined_call_operand.hbm [shape: bf16[32,32], index: 10, kind: input, shape index: {}]   ;;  %s2164_s11 = inlined_call_operand.vmem [shape: f32[1,32], index: 11, kind: input, shape index: {}]   ;;  %s2165_s12 = inlined_call_operand.hbm [shape: bf16[32,128], index: 12, kind: input, shape index: {}]   ;;  %s2166_s13 = inlined_call_operand.vmem [shape: f32[1,128], index: 13, kind: input, shape index: {}]   ;;  %s2167_s14 = inlined_call_operand.vmem [shape: bf16[128,32], index: 14, kind: input, shape index: {}]   ;;  %s2168_s15 = inlined_call_operand.vmem [shape: f32[1,32], index: 15, kind: input, shape index: {}]   ;;  %s2169_s16 = inlined_call_operand.hbm [shape: f32[16,32], index: 16, kind: output, shape index: {}]  }
   0x1   :  { %2170 = sst [smem:[#allocation15_spill]] %s2153_s0 }
   0x2   :  { %2171 = sst [smem:[#allocation16_spill]] %s2169_s16 }
   0x3   :  { %21 = vsyncpa [#allocation5], 0 }
   0x4   :  { %22 = vsyncpa [#allocation3], 0 }
   0x5   :  { %23 = vsyncpa [#allocation8], 0  ;;  %s65_s23 = sshll.u32 %s2163_s10, 4  ;;  %s66_s23 = int_to_ptr.hbm [resolvable:$true] %s65_s23 }
   0x6   :  { %24 = vsyncpa [#allocation4], 0  ;;  %s1640_s24 = smov [#allocation7]   ;;  %s2172_s28 = sld [smem:[#allocation15_spill]] }
   0x7   :  { %s67_s25 = sshll.u32 %s1640_s24, 4  ;;  %s1641_s30 = smov 64   ;;  %s68_s25 = int_to_ptr.vmem [resolvable:$true] %s67_s25 }
   0x8   :  { %s1642_s0 = smov 4   ;;  %s1643_s17 = smov [#allocation2]  }
   0x9   :  { %73 = dma.hbm_to_vmem [thread:$0]  %s66_s23, 256, %s68_s25, [#allocation8], %s1641_s30, %s1641_s30, %s1642_s0  }
   0xa   :  { %s43_s20 = sshll.u32 %s2156_s3, 4  ;;  %s1644_s10 = smov [#allocation6]   ;;  %s44_s20 = int_to_ptr.hbm [resolvable:$true] %s43_s20 }
   0xb   :  { %s45_s21 = sshll.u32 %s1644_s10, 4  ;;  %s80_s16 = sshll.u32 %s2165_s12, 4  ;;  %s46_s21 = int_to_ptr.vmem [resolvable:$true] %s45_s21  ;;  %s81_s16 = int_to_ptr.hbm [resolvable:$true] %s80_s16 }
   0xc   :  { %s30_s29 = sshll.u32 %s2172_s28, 4  ;;  %s1645_s26 = smov [#allocation9]   ;;  %s31_s29 = int_to_ptr.hbm [resolvable:$true] %s30_s29 }
   0xd   :  { %33 = dma.hbm_to_smem %s31_s29, 16, %s1643_s17, [#allocation5]  }
   0xe   :  { %48 = dma.hbm_to_vmem [thread:$0]  %s44_s20, 128, %s46_s21, [#allocation3]  }
   0xf   :  { %s82_s27 = sshll.u32 %s1645_s26, 4  ;;  %s83_s27 = int_to_ptr.vmem [resolvable:$true] %s82_s27 }
  0x10   :  { %88 = dma.hbm_to_vmem [thread:$0]  %s81_s16, 256, %s83_s27, [#allocation8], %s1641_s30, %s1641_s30, %s1642_s0  }
  0x11   :  { %1632 = dma.done.wait [#allocation5], 16  }
  0x12   :  { %1633 = vsyncadd [#allocation5], 4294967280 }
  0x13   :  { %1634 = dma.done.wait [#allocation3], 128  }
  0x14   :  { %1635 = vsyncadd [#allocation3], 4294967168 }
  0x15   :  { %1636 = dma.done.wait [#allocation8], 512  }
  0x16   :  { %1637 = vsyncadd [#allocation8], 4294966784 }
  0x17   :  { %111 = sfence }
  0x18   :  { %v1428_v0 = vld [vmem:[%s2159_s6 + $0x8] sm:$0xff]  ;;  %v1427_v1 = vld [vmem:[%s2159_s6] sm:$0xff]  ;;  %vm139_vm0 = vcmask 261120   ;;  %vm581_vm1 = vcmask 64512   ;;  %vm777_vm2 = vcmask 1043456   ;;  %s1381_s0 = sld [smem:[#allocation2 + $0x1]] }
  0x19   :  { %v113_v2 = vld [vmem:[%s2155_s2] sm:$0xff]  ;;  %v1426_v3 = vld [vmem:[%s2157_s4 + $0x8] sm:$0xff]  ;;  %186 = vmatpush.bf16.msra.mxu2 %v1428_v0  ;;  %s1147_s17 = sld [smem:[#allocation2]]  ;;  %s1648_s16 = smov 8  }
  0x1a   :  { %v114_v4 = vld [vmem:[%s2155_s2 + $0x8] sm:$0xff]  ;;  %v1425_v5 = vld [vmem:[%s2157_s4] sm:$0xff]  ;;  %149 = vmatpush.bf16.msra.mxu0 %v1426_v3  ;;  %s2173_s12 = sld [smem:[#allocation16_spill]] }
  0x1b   :  { %v115_v6 = vld [vmem:[%s2154_s1] sm:$0xff]  ;;  %v116_v7 = vld [vmem:[%s2154_s1 + $0x8] sm:$0xff]  ;;  %v118_v9 = vpack.c.bf16 %v114_v4, %v113_v2 }
  0x1c   :  { %v1430_v8 = vld [vmem:[%s2161_s8 + $0x8] sm:$0xff]  ;;  %v117_v10 = vpack.c.bf16 %v116_v7, %v115_v6  ;;  %v1429_v11 = vld [vmem:[%s2161_s8] sm:$0xff] }
  0x1d   :  { %187 = vmatpush.bf16.msra.mxu2 %v1427_v1  ;;  %v228_v12 = vld [vmem:[#allocation6] sm:$0xff] }
  0x1e   :  { %150 = vmatpush.bf16.msra.mxu0 %v1425_v5  ;;  %v230_v13 = vrot.slane %v228_v12, 1  ;;  %v231_v14 = vrot.slane %v228_v12, 2  ;;  %v232_v15 = vrot.slane %v228_v12, 3  ;;  %v233_v16 = vrot.slane %v228_v12, 4  ;;  %v1452_v20 = vld [vmem:[%s2160_s7] ss:$0 sm:$0xff] }
  0x1f   :  { %v234_v17 = vrot.slane %v228_v12, 5  ;;  %v235_v18 = vrot.slane %v228_v12, 6  ;;  %v236_v19 = vrot.slane %v228_v12, 7  ;;  %v1785_v21 = vld [vmem:[%s2158_s5] ss:$0 sm:$0xff]  ;;  %v1787_v22 = vperm.slane %v228_v12, 0 }
  0x20   :  { %1330 = vmatmul.msk.bf16.vlgmr.msra.gmra.mxu2 %vm139_vm0, %v118_v9  ;;  %v1789_v23 = vperm.slane %v230_v13, 0  ;;  %v1791_v24 = vperm.slane %v231_v14, 0  ;;  %v1793_v25 = vperm.slane %v232_v15, 0  ;;  %v1795_v27 = vperm.slane %v233_v16, 0  ;;  %s1382_s5 = sld [smem:[#allocation2 + $0x2]]  ;;  %s1298_s29 = sshll.u32 %s2173_s12, 4  ;;  %s1299_s29 = int_to_ptr.hbm [resolvable:$true] %s1298_s29 }
  0x21   :  { %220 = vmatpush.bf16.msrb.mxu2 %v1430_v8  ;;  %1321 = vmatmul.msk.bf16.vlgmr.msra.gmra.mxu0 %vm139_vm0, %v117_v10  ;;  %v1797_v28 = vperm.slane %v234_v17, 0  ;;  %v1799_v29 = vperm.slane %v235_v18, 0  ;;  %v1801_v30 = vperm.slane %v236_v19, 0  ;;  %s1383_s7 = sld [smem:[#allocation2 + $0x3]] }
  0x25   :  { %221 = vmatpush.bf16.msrb.mxu2 %v1429_v11 }
  0x30   :  { %1339 = vmatmul.msk.bf16.vlgmr.msrb.gmra.mxu2 %vm139_vm0, %v118_v9 }
  0x9e   :  { %v152_v32 = vpop.f32.mrf.mxu0 }
  0x9f   :  { %v153_v33 = vadd.f32 %v1785_v21, %v152_v32 }
  0xa1   :  { %v285_v60 = vpack.c.bf16 %v153_v33, %v153_v33 }
  0xa3   :  { %v189_v26 = vpop.f32.mrf.mxu2 }
  0xa4   :  { %v190_v31 = vadd.f32 %v1452_v20, %v189_v26 }
  0xa6   :  { %v253_v34 = vmul.f32 %v1787_v22, %v190_v31  ;;  %v254_v35 = vmul.f32 %v1789_v23, %v190_v31  ;;  %v255_v36 = vmul.f32 %v1791_v24, %v190_v31  ;;  %v256_v37 = vmul.f32 %v1793_v25, %v190_v31  ;;  %v154_v26 = vpop.f32.mrf.mxu0 }
  0xa7   :  { %v257_v38 = vmul.f32 %v1795_v27, %v190_v31  ;;  %v258_v39 = vmul.f32 %v1797_v28, %v190_v31  ;;  %v259_v40 = vmul.f32 %v1799_v29, %v190_v31  ;;  %v260_v41 = vmul.f32 %v1801_v30, %v190_v31 }
  0xa8   :  { %v287_v42 = vpack.c.bf16 %v253_v34, %v253_v34  ;;  %v288_v43 = vpack.c.bf16 %v254_v35, %v254_v35  ;;  %v289_v44 = vpack.c.bf16 %v255_v36, %v255_v36  ;;  %v290_v45 = vpack.c.bf16 %v256_v37, %v256_v37 }
  0xa9   :  { %v291_v46 = vpack.c.bf16 %v257_v38, %v257_v38  ;;  %v292_v47 = vpack.c.bf16 %v258_v39, %v258_v39  ;;  %v293_v48 = vpack.c.bf16 %v259_v40, %v259_v40  ;;  %v294_v49 = vpack.c.bf16 %v260_v41, %v260_v41 }
  0xaa   :  { %v323_v50 = vsel %vm139_vm0, %v287_v42, 0  ;;  %v339_v51 = vsel %vm139_vm0, %v288_v43, 0  ;;  %v355_v52 = vsel %vm139_vm0, %v289_v44, 0  ;;  %v371_v53 = vsel %vm139_vm0, %v290_v45, 0 }
  0xab   :  { %v191_v54 = vpop.f32.mrf.mxu2  ;;  %332 = vmatpush.bf16.xpose.msra.mxu3 %v323_v50  ;;  %348 = vmatpush.bf16.xpose.msrb.mxu0 %v339_v51  ;;  %v387_v55 = vsel %vm139_vm0, %v291_v46, 0  ;;  %v403_v56 = vsel %vm139_vm0, %v292_v47, 0  ;;  %v419_v57 = vsel %vm139_vm0, %v293_v48, 0  ;;  %v435_v58 = vsel %vm139_vm0, %v294_v49, 0 }
  0xac   :  { %v192_v59 = vadd.f32 %v1452_v20, %v191_v54  ;;  %364 = vmatpush.bf16.xpose.msra.mxu1 %v355_v52  ;;  %380 = vmatpush.bf16.xpose.msra.mxu2 %v371_v53  ;;  %v155_v31 = vadd.f32 %v1785_v21, %v154_v26  ;;  %v1454_v53 = vld [vmem:[%s2162_s9] ss:$0 sm:$0xff] }
  0xae   :  { %v261_v61 = vmul.f32 %v1787_v22, %v192_v59  ;;  %v262_v62 = vmul.f32 %v1789_v23, %v192_v59  ;;  %v263_v63 = vmul.f32 %v1791_v24, %v192_v59  ;;  %v264_v0 = vmul.f32 %v1793_v25, %v192_v59 }
  0xaf   :  { %v265_v9 = vmul.f32 %v1795_v27, %v192_v59  ;;  %v266_v10 = vmul.f32 %v1797_v28, %v192_v59  ;;  %v267_v11 = vmul.f32 %v1799_v29, %v192_v59  ;;  %v268_v12 = vmul.f32 %v1801_v30, %v192_v59 }
  0xb0   :  { %v295_v1 = vpack.c.bf16 %v261_v61, %v261_v61  ;;  %v296_v2 = vpack.c.bf16 %v262_v62, %v262_v62  ;;  %v297_v3 = vpack.c.bf16 %v263_v63, %v263_v63  ;;  %v298_v4 = vpack.c.bf16 %v264_v0, %v264_v0 }
  0xb1   :  { %v299_v13 = vpack.c.bf16 %v265_v9, %v265_v9  ;;  %v300_v14 = vpack.c.bf16 %v266_v10, %v266_v10  ;;  %v301_v15 = vpack.c.bf16 %v267_v11, %v267_v11  ;;  %v302_v16 = vpack.c.bf16 %v268_v12, %v268_v12 }
  0xb2   :  { %1340 = vmatmul.msk.bf16.vlgmr.msra.gmra.mxu3 %vm139_vm0, %v285_v60  ;;  %1341 = vmatmul.msk.bf16.vlgmr.msrb.gmra.mxu0 %vm139_vm0, %v285_v60  ;;  %v454_v5 = vsel %vm139_vm0, %v295_v1, 0  ;;  %v470_v6 = vsel %vm139_vm0, %v296_v2, 0  ;;  %v486_v7 = vsel %vm139_vm0, %v297_v3, 0  ;;  %v502_v8 = vsel %vm139_vm0, %v298_v4, 0 }
  0xb3   :  { %396 = vmatpush.bf16.xpose.msrb.mxu3 %v387_v55  ;;  %412 = vmatpush.bf16.xpose.msra.mxu0 %v403_v56  ;;  %v518_v17 = vsel %vm139_vm0, %v299_v13, 0  ;;  %v534_v18 = vsel %vm139_vm0, %v300_v14, 0  ;;  %v550_v19 = vsel %vm139_vm0, %v301_v15, 0  ;;  %v566_v20 = vsel %vm139_vm0, %v302_v16, 0  ;;  %v223_v33 = vpop.f32.mrf.mxu2 }
  0xb4   :  { %428 = vmatpush.bf16.xpose.msrb.mxu1 %v419_v57  ;;  %444 = vmatpush.bf16.xpose.msrb.mxu2 %v435_v58  ;;  %v286_v32 = vpack.c.bf16 %v155_v31, %v155_v31  ;;  %v224_v56 = vadd.f32 %v1454_v53, %v223_v33 }
  0xb5   :  { %1342 = vmatmul.msk.bf16.vlgmr.msra.gmra.mxu1 %vm139_vm0, %v285_v60  ;;  %1343 = vmatmul.msk.bf16.vlgmr.msra.gmra.mxu2 %vm139_vm0, %v285_v60 }
  0xb6   :  { %v269_v61 = vmul.f32 %v1787_v22, %v224_v56  ;;  %v270_v62 = vmul.f32 %v1789_v23, %v224_v56  ;;  %v271_v63 = vmul.f32 %v1791_v24, %v224_v56  ;;  %v272_v2 = vmul.f32 %v1793_v25, %v224_v56 }
  0xb7   :  { %v273_v3 = vmul.f32 %v1795_v27, %v224_v56  ;;  %v274_v4 = vmul.f32 %v1797_v28, %v224_v56  ;;  %v275_v11 = vmul.f32 %v1799_v29, %v224_v56  ;;  %v276_v15 = vmul.f32 %v1801_v30, %v224_v56 }
  0xb9   :  { %v307_v9 = vpack.c.bf16 %v273_v3, %v273_v3  ;;  %v308_v10 = vpack.c.bf16 %v274_v4, %v274_v4  ;;  %v310_v26 = vpack.c.bf16 %v276_v15, %v276_v15 }
  0xbb   :  { %463 = vmatpush.bf16.xpose.msra.mxu3 %v454_v5  ;;  %479 = vmatpush.bf16.xpose.msrb.mxu0 %v470_v6  ;;  %v1853_v34 = vpop.f32.mrf.mxu2  ;;  %v303_v5 = vpack.c.bf16 %v269_v61, %v269_v61  ;;  %v304_v6 = vpack.c.bf16 %v270_v62, %v270_v62 }
  0xbc   :  { %495 = vmatpush.bf16.xpose.msra.mxu1 %v486_v7  ;;  %511 = vmatpush.bf16.xpose.msra.mxu2 %v502_v8  ;;  %v305_v7 = vpack.c.bf16 %v271_v63, %v271_v63  ;;  %v306_v8 = vpack.c.bf16 %v272_v2, %v272_v2 }
  0xbd   :  { %v779_v12 = vsel %vm777_vm2, %v303_v5, 0  ;;  %v798_v13 = vsel %vm777_vm2, %v304_v6, 0 }
  0xbe   :  { %v817_v14 = vsel %vm777_vm2, %v305_v7, 0  ;;  %v836_v16 = vsel %vm777_vm2, %v306_v8, 0 }
  0xc2   :  { %1344 = vmatmul.msk.bf16.vlgmr.msrb.gmra.mxu3 %vm139_vm0, %v285_v60  ;;  %1345 = vmatmul.msk.bf16.vlgmr.msra.gmra.mxu0 %vm139_vm0, %v285_v60 }
  0xc3   :  { %527 = vmatpush.bf16.xpose.msrb.mxu3 %v518_v17  ;;  %543 = vmatpush.bf16.xpose.msra.mxu0 %v534_v18  ;;  %v855_v17 = vsel %vm777_vm2, %v307_v9, 0  ;;  %v874_v18 = vsel %vm777_vm2, %v308_v10, 0 }
  0xc5   :  { %1346 = vmatmul.msk.bf16.vlgmr.msrb.gmra.mxu1 %vm139_vm0, %v285_v60  ;;  %1347 = vmatmul.msk.bf16.vlgmr.msrb.gmra.mxu2 %vm139_vm0, %v285_v60 }
  0xc6   :  { %559 = vmatpush.bf16.xpose.msrb.mxu1 %v550_v19  ;;  %575 = vmatpush.bf16.xpose.msrb.mxu2 %v566_v20  ;;  %v309_v19 = vpack.c.bf16 %v275_v11, %v275_v11 }
  0xc8   :  { %v893_v33 = vsel %vm777_vm2, %v309_v19, 0 }
  0xd2   :  { %1348 = vmatmul.msk.bf16.vlgmr.msra.gmra.mxu3 %vm139_vm0, %v286_v32  ;;  %1349 = vmatmul.msk.bf16.vlgmr.msrb.gmra.mxu0 %vm139_vm0, %v286_v32 }
  0xd3   :  { %788 = vmatpush.bf16.msra.mxu3 %v779_v12  ;;  %807 = vmatpush.bf16.msrb.mxu0 %v798_v13 }
  0xd5   :  { %1350 = vmatmul.msk.bf16.vlgmr.msra.gmra.mxu1 %vm139_vm0, %v286_v32  ;;  %1351 = vmatmul.msk.bf16.vlgmr.msra.gmra.mxu2 %vm139_vm0, %v286_v32 }
  0xd6   :  { %826 = vmatpush.bf16.msra.mxu1 %v817_v14  ;;  %845 = vmatpush.bf16.msra.mxu2 %v836_v16 }
  0xe2   :  { %1352 = vmatmul.msk.bf16.vlgmr.msrb.gmra.mxu3 %vm139_vm0, %v286_v32  ;;  %1353 = vmatmul.msk.bf16.vlgmr.msra.gmra.mxu0 %vm139_vm0, %v286_v32 }
  0xe3   :  { %864 = vmatpush.bf16.msrb.mxu3 %v855_v17  ;;  %883 = vmatpush.bf16.msra.mxu0 %v874_v18 }
  0xe5   :  { %1354 = vmatmul.msk.bf16.vlgmr.msrb.gmra.mxu1 %vm139_vm0, %v286_v32  ;;  %1355 = vmatmul.msk.bf16.vlgmr.msrb.gmra.mxu2 %vm139_vm0, %v286_v32 }
  0xe6   :  { %902 = vmatpush.bf16.msrb.mxu1 %v893_v33 }
 0x12f   :  { %v1855_v21 = vpop.f32.mrf.mxu0 }
 0x130   :  { %v585_v36 = vsel %vm581_vm1, %v1855_v21, -inf }
 0x131   :  { %586 = vmax.xlane.f32.xlu1 %v585_v36 }
 0x132   :  { %v1857_v35 = vpop.f32.mrf.mxu1 }
 0x133   :  { %v588_v42 = vsel %vm581_vm1, %v1857_v35, -inf }
 0x135   :  { %v1861_v37 = vpop.f32.mrf.mxu3 }
 0x136   :  { %v582_v39 = vsel %vm581_vm1, %v1861_v37, -inf }
 0x137   :  { %v352_v40 = vpop.f32.mrf.mxu0  ;;  %583 = vmax.xlane.f32.xlu0 %v582_v39 }
 0x138   :  { %v1863_v38 = vpop.f32.mrf.mxu2  ;;  %v912_v40 = vsel %vm777_vm2, %v310_v26, 0 }
 0x139   :  { %589 = vmax.xlane.f32.xlu1 %v588_v42  ;;  %v591_v45 = vsel %vm581_vm1, %v1863_v38, -inf  ;;  %921 = vmatpush.bf16.msrb.mxu2 %v912_v40  ;;  %v226_v42 = vadd.f32 %v1454_v53, %v1853_v34 }
 0x13a   :  { %v368_v41 = vpop.f32.mrf.mxu1 }
 0x13b   :  { %v281_v34 = vmul.f32 %v1795_v27, %v226_v42  ;;  %v282_v53 = vmul.f32 %v1797_v28, %v226_v42  ;;  %v283_v27 = vmul.f32 %v1799_v29, %v226_v42 }
 0x13d   :  { %v336_v43 = vpop.f32.mrf.mxu3  ;;  %v315_v63 = vpack.c.bf16 %v281_v34, %v281_v34  ;;  %v317_v5 = vpack.c.bf16 %v283_v27, %v283_v27 }
 0x13f   :  { %v1871_v46 = vpop.f32.mrf.mxu0  ;;  %592 = vmax.xlane.f32.xlu0 %v591_v45  ;;  %v1965_v9 = vsel %vm777_vm2, %v317_v5, 0 }
 0x140   :  { %v384_v44 = vpop.f32.mrf.mxu2  ;;  %v597_v51 = vsel %vm581_vm1, %v1871_v46, -inf }
 0x142   :  { %v1873_v47 = vpop.f32.mrf.mxu1 }
 0x143   :  { %v600_v48 = vsel %vm581_vm1, %v1873_v47, -inf }
 0x144   :  { %601 = vmax.xlane.f32.xlu1 %v600_v48 }
 0x145   :  { %v1877_v49 = vpop.f32.mrf.mxu3 }
 0x146   :  { %v594_v52 = vsel %vm581_vm1, %v1877_v49, -inf }
 0x147   :  { %v416_v54 = vpop.f32.mrf.mxu0  ;;  %598 = vmax.xlane.f32.xlu0 %v597_v51  ;;  %595 = vmax.xlane.f32.xlu2 %v594_v52  ;;  %v278_v51 = vmul.f32 %v1789_v23, %v226_v42  ;;  %v277_v52 = vmul.f32 %v1787_v22, %v226_v42  ;;  %v316_v23 = vpack.c.bf16 %v282_v53, %v282_v53 }
 0x148   :  { %v1879_v50 = vpop.f32.mrf.mxu2  ;;  %v280_v54 = vmul.f32 %v1793_v25, %v226_v42 }
 0x149   :  { %v603_v59 = vsel %vm581_vm1, %v1879_v50, -inf  ;;  %v1951_v2 = vsel %vm777_vm2, %v316_v23, 0 }
 0x14a   :  { %v432_v55 = vpop.f32.mrf.mxu1  ;;  %v314_v61 = vpack.c.bf16 %v280_v54, %v280_v54 }
 0x14b   :  { %v279_v55 = vmul.f32 %v1791_v24, %v226_v42 }
 0x14c   :  { %v1941_v25 = vsel %vm777_vm2, %v314_v61, 0 }
 0x14d   :  { %v400_v57 = vpop.f32.mrf.mxu3  ;;  %v313_v62 = vpack.c.bf16 %v279_v55, %v279_v55 }
 0x14e   :  { %v284_v57 = vmul.f32 %v1801_v30, %v226_v42  ;;  %v1948_v30 = vsel %vm777_vm2, %v315_v63, 0 }
 0x14f   :  { %v1890_v60 = vpop.f32.mrf.mxu0  ;;  %604 = vmax.xlane.f32.xlu2 %v603_v59  ;;  %v311_v59 = vpack.c.bf16 %v277_v52, %v277_v52  ;;  %v1945_v28 = vsel %vm777_vm2, %v313_v62, 0 }
 0x150   :  { %v448_v58 = vpop.f32.mrf.mxu2  ;;  %v609_v1 = vsel %vm581_vm1, %v1890_v60, -inf }
 0x151   :  { %610 = vmax.xlane.f32.xlu1 %v609_v1  ;;  %v312_v58 = vpack.c.bf16 %v278_v51, %v278_v51  ;;  %v318_v1 = vpack.c.bf16 %v284_v57, %v284_v57  ;;  %v1938_v24 = vsel %vm777_vm2, %v311_v59, 0 }
 0x152   :  { %v1895_v0 = vpop.f32.mrf.mxu1 }
 0x153   :  { %v612_v45 = vsel %vm581_vm1, %v1895_v0, -inf  ;;  %v1935_v22 = vsel %vm777_vm2, %v312_v58, 0  ;;  %v1954_v3 = vsel %vm777_vm2, %v318_v1, 0 }
 0x155   :  { %v1910_v20 = vpop.f32.mrf.mxu3 }
 0x156   :  { %v606_v32 = vsel %vm581_vm1, %v1910_v20, -inf }
 0x157   :  { %v483_v36 = vpop.f32.mrf.mxu0  ;;  %607 = vmax.xlane.f32.xlu2 %v606_v32 }
 0x158   :  { %v1912_v31 = vpop.f32.mrf.mxu2 }
 0x159   :  { %v615_v39 = vsel %vm581_vm1, %v1912_v31, -inf }
 0x15a   :  { %v499_v41 = vpop.f32.mrf.mxu1  ;;  %616 = vmax.xlane.f32.xlu0 %v615_v39 }
 0x15d   :  { %v467_v43 = vpop.f32.mrf.mxu3 }
 0x15f   :  { %v1923_v48 = vpop.f32.mrf.mxu0  ;;  %613 = vmax.xlane.f32.xlu2 %v612_v45 }
 0x160   :  { %v515_v44 = vpop.f32.mrf.mxu2  ;;  %v621_v13 = vsel %vm581_vm1, %v1923_v48, -inf }
 0x162   :  { %v1929_v56 = vpop.f32.mrf.mxu1 }
 0x163   :  { %v624_v55 = vsel %vm581_vm1, %v1929_v56, -inf }
 0x165   :  { %v1956_v4 = vpop.f32.mrf.mxu3 }
 0x166   :  { %v618_v29 = vsel %vm581_vm1, %v1956_v4, -inf }
 0x167   :  { %v547_v7 = vpop.f32.mrf.mxu0  ;;  %619 = vmax.xlane.f32.xlu0 %v618_v29 }
 0x168   :  { %v1958_v6 = vpop.f32.mrf.mxu2 }
 0x169   :  { %v627_v8 = vsel %vm581_vm1, %v1958_v6, -inf }
 0x16a   :  { %v563_v10 = vpop.f32.mrf.mxu1  ;;  %628 = vmax.xlane.f32.xlu2 %v627_v8 }
 0x16d   :  { %v531_v11 = vpop.f32.mrf.mxu3 }
 0x16f   :  { %622 = vmax.xlane.f32.xlu0 %v621_v13 }
 0x170   :  { %v579_v12 = vpop.f32.mrf.mxu2 }
 0x1a4   :  { %v587_v14 = vpop.xlane.xlu1 %586 }
 0x1a5   :  { %v631_v15 = vsub.f32 %v1855_v21, %v587_v14 }
 0x1a7   :  { %v648_v16 = vmul.f32 1.442695, %v631_v15 }
 0x1a9   :  { %1458 = vpow2.f32 %v648_v16 }
 0x1aa   :  { %v584_v17 = vpop.xlane.xlu0 %583 }
 0x1ab   :  { %v630_v18 = vsub.f32 %v1861_v37, %v584_v17 }
 0x1ac   :  { %v590_v33 = vpop.xlane.xlu1 %589 }
 0x1ad   :  { %v646_v19 = vmul.f32 1.442695, %v630_v18  ;;  %v632_v21 = vsub.f32 %v1857_v35, %v590_v33 }
 0x1af   :  { %v1971_v26 = vpop.eup %1458  ;;  %1460 = vpow2.f32 %v646_v19  ;;  %v650_v42 = vmul.f32 1.442695, %v632_v21 }
 0x1b0   :  { %v681_v32 = vsel %vm581_vm1, %v1971_v26, 0.0 }
 0x1b1   :  { %682 = vadd.xlane.f32.xlu0 %v681_v32 }
 0x1b2   :  { %v593_v36 = vpop.xlane.xlu0 %592 }
 0x1b3   :  { %v633_v39 = vsub.f32 %v1863_v38, %v593_v36 }
 0x1b5   :  { %v1976_v40 = vpop.eup %1460  ;;  %v652_v41 = vmul.f32 1.442695, %v633_v39 }
 0x1b6   :  { %v678_v37 = vsel %vm581_vm1, %v1976_v40, 0.0 }
 0x1b7   :  { %1462 = vpow2.f32 %v652_v41  ;;  %679 = vadd.xlane.f32.xlu1 %v678_v37  ;;  %v602_v45 = vpop.xlane.xlu1 %601 }
 0x1b8   :  { %1464 = vpow2.f32 %v650_v42  ;;  %v636_v35 = vsub.f32 %v1873_v47, %v602_v45 }
 0x1ba   :  { %v599_v43 = vpop.xlane.xlu0 %598  ;;  %v596_v44 = vpop.xlane.xlu2 %595  ;;  %v658_v57 = vmul.f32 1.442695, %v636_v35 }
 0x1bb   :  { %v634_v51 = vsub.f32 %v1877_v49, %v596_v44  ;;  %v635_v38 = vsub.f32 %v1871_v46, %v599_v43 }
 0x1bd   :  { %v1982_v52 = vpop.eup %1462  ;;  %v654_v54 = vmul.f32 1.442695, %v634_v51  ;;  %v656_v53 = vmul.f32 1.442695, %v635_v38 }
 0x1be   :  { %v687_v34 = vsel %vm581_vm1, %v1982_v52, 0.0  ;;  %v1990_v58 = vpop.eup %1464 }
 0x1bf   :  { %625 = vmax.xlane.f32.xlu1 %v624_v55  ;;  %688 = vadd.xlane.f32.xlu2 %v687_v34  ;;  %1466 = vpow2.f32 %v654_v54  ;;  %v684_v63 = vsel %vm581_vm1, %v1990_v58, 0.0 }
 0x1c0   :  { %1468 = vpow2.f32 %v656_v53 }
 0x1c1   :  { %1470 = vpow2.f32 %v658_v57 }
 0x1c2   :  { %v605_v49 = vpop.xlane.xlu2 %604 }
 0x1c3   :  { %v637_v59 = vsub.f32 %v1879_v50, %v605_v49 }
 0x1c4   :  { %v611_v46 = vpop.xlane.xlu1 %610 }
 0x1c5   :  { %v660_v61 = vmul.f32 1.442695, %v637_v59  ;;  %v1993_v47 = vpop.eup %1466  ;;  %v639_v62 = vsub.f32 %v1890_v60, %v611_v46 }
 0x1c6   :  { %v690_v23 = vsel %vm581_vm1, %v1993_v47, 0.0  ;;  %v2000_v50 = vpop.eup %1468 }
 0x1c7   :  { %1472 = vpow2.f32 %v660_v61  ;;  %685 = vadd.xlane.f32.xlu1 %v684_v63  ;;  %691 = vadd.xlane.f32.xlu2 %v690_v23  ;;  %v664_v1 = vmul.f32 1.442695, %v639_v62  ;;  %v2003_v7 = vpop.eup %1470  ;;  %v693_v12 = vsel %vm581_vm1, %v2000_v50, 0.0 }
 0x1c9   :  { %1474 = vpow2.f32 %v664_v1 }
 0x1ca   :  { %v608_v27 = vpop.xlane.xlu2 %607 }
 0x1cb   :  { %v638_v29 = vsub.f32 %v1910_v20, %v608_v27  ;;  %v696_v20 = vsel %vm581_vm1, %v2003_v7, 0.0 }
 0x1cd   :  { %v617_v5 = vpop.xlane.xlu0 %616  ;;  %v2006_v8 = vpop.eup %1472  ;;  %v662_v10 = vmul.f32 1.442695, %v638_v29 }
 0x1ce   :  { %v641_v60 = vsub.f32 %v1912_v31, %v617_v5  ;;  %v699_v13 = vsel %vm581_vm1, %v2006_v8, 0.0 }
 0x1cf   :  { %1476 = vpow2.f32 %v662_v10  ;;  %694 = vadd.xlane.f32.xlu1 %v693_v12  ;;  %700 = vadd.xlane.f32.xlu0 %v699_v13  ;;  %v2015_v15 = vpop.eup %1474 }
 0x1d0   :  { %v668_v11 = vmul.f32 1.442695, %v641_v60  ;;  %697 = vadd.xlane.f32.xlu2 %v696_v20  ;;  %v705_v33 = vsel %vm581_vm1, %v2015_v15, 0.0 }
 0x1d2   :  { %1478 = vpow2.f32 %v668_v11  ;;  %v614_v31 = vpop.xlane.xlu2 %613 }
 0x1d3   :  { %v640_v14 = vsub.f32 %v1895_v0, %v614_v31 }
 0x1d5   :  { %v2017_v16 = vpop.eup %1476  ;;  %v666_v17 = vmul.f32 1.442695, %v640_v14 }
 0x1d6   :  { %v702_v19 = vsel %vm581_vm1, %v2017_v16, 0.0 }
 0x1d7   :  { %1480 = vpow2.f32 %v666_v17  ;;  %703 = vadd.xlane.f32.xlu0 %v702_v19 }
 0x1d8   :  { %v2019_v18 = vpop.eup %1478  ;;  %706 = vadd.xlane.f32.xlu2 %v705_v33 }
 0x1d9   :  { %v711_v32 = vsel %vm581_vm1, %v2019_v18, 0.0 }
 0x1da   :  { %712 = vadd.xlane.f32.xlu1 %v711_v32  ;;  %v620_v0 = vpop.xlane.xlu0 %619 }
 0x1db   :  { %v642_v39 = vsub.f32 %v1956_v4, %v620_v0 }
 0x1dd   :  { %v629_v36 = vpop.xlane.xlu2 %628  ;;  %v2029_v41 = vpop.eup %1480  ;;  %v670_v37 = vmul.f32 1.442695, %v642_v39 }
 0x1de   :  { %v645_v21 = vsub.f32 %v1958_v6, %v629_v36  ;;  %v708_v43 = vsel %vm581_vm1, %v2029_v41, 0.0 }
 0x1df   :  { %1482 = vpow2.f32 %v670_v37  ;;  %709 = vadd.xlane.f32.xlu0 %v708_v43 }
 0x1e0   :  { %v676_v42 = vmul.f32 1.442695, %v645_v21 }
 0x1e2   :  { %1484 = vpow2.f32 %v676_v42  ;;  %v623_v44 = vpop.xlane.xlu0 %622 }
 0x1e3   :  { %v643_v45 = vsub.f32 %v1923_v48, %v623_v44 }
 0x1e5   :  { %v2034_v51 = vpop.eup %1482  ;;  %v672_v38 = vmul.f32 1.442695, %v643_v45 }
 0x1e6   :  { %v714_v4 = vsel %vm581_vm1, %v2034_v51, 0.0 }
 0x1e7   :  { %1486 = vpow2.f32 %v672_v38  ;;  %715 = vadd.xlane.f32.xlu1 %v714_v4 }
 0x1e8   :  { %v2036_v54 = vpop.eup %1484 }
 0x1e9   :  { %v723_v6 = vsel %vm581_vm1, %v2036_v54, 0.0 }
 0x1ea   :  { %724 = vadd.xlane.f32.xlu2 %v723_v6 }
 0x1ed   :  { %v2042_v35 = vpop.eup %1486 }
 0x1ee   :  { %v717_v55 = vsel %vm581_vm1, %v2042_v35, 0.0 }
 0x1ef   :  { %718 = vadd.xlane.f32.xlu0 %v717_v55 }
 0x224   :  { %v683_v48 = vpop.xlane.xlu0 %682 }
 0x225   :  { %1488 = vrcp.f32 %v683_v48 }
 0x22a   :  { %v680_v34 = vpop.xlane.xlu1 %679 }
 0x22b   :  { %v1489_v53 = vpop.eup %1488  ;;  %1490 = vrcp.f32 %v680_v34 }
 0x22c   :  { %v743_v57 = vmul.f32 %v1489_v53, %v1971_v26 }
 0x22e   :  { %v759_v49 = vpack.c.bf16 %v743_v57, %v743_v57 }
 0x230   :  { %1357 = vmatmul.msk.bf16.vlgmr.msrb.gmra.mxu0 %vm581_vm1, %v759_v49 }
 0x231   :  { %v1491_v59 = vpop.eup %1490  ;;  %959 = vmatpush.bf16.msrb.mxu0 %v1935_v22 }
 0x232   :  { %v742_v46 = vmul.f32 %v1491_v59, %v1976_v40  ;;  %v626_v61 = vpop.xlane.xlu1 %625  ;;  %v689_v62 = vpop.xlane.xlu2 %688 }
 0x233   :  { %v644_v63 = vsub.f32 %v1929_v56, %v626_v61  ;;  %1492 = vrcp.f32 %v689_v62 }
 0x234   :  { %v758_v23 = vpack.c.bf16 %v742_v46, %v742_v46 }
 0x235   :  { %v674_v1 = vmul.f32 1.442695, %v644_v63 }
 0x236   :  { %1356 = vmatmul.msk.bf16.vlgmr.msra.gmra.mxu3 %vm581_vm1, %v758_v23 }
 0x237   :  { %1494 = vpow2.f32 %v674_v1  ;;  %940 = vmatpush.bf16.msra.mxu3 %v1938_v24 }
 0x239   :  { %v1493_v26 = vpop.eup %1492 }
 0x23a   :  { %v745_v27 = vmul.f32 %v1493_v26, %v1982_v52  ;;  %v686_v5 = vpop.xlane.xlu1 %685  ;;  %v692_v22 = vpop.xlane.xlu2 %691 }
 0x23b   :  { %1496 = vrcp.f32 %v686_v5 }
 0x23c   :  { %v761_v29 = vpack.c.bf16 %v745_v27, %v745_v27  ;;  %1498 = vrcp.f32 %v692_v22 }
 0x23d   :  { %v2054_v40 = vpop.eup %1494 }
 0x23e   :  { %1359 = vmatmul.msk.bf16.vlgmr.msra.gmra.mxu2 %vm581_vm1, %v761_v29  ;;  %v720_v56 = vsel %vm581_vm1, %v2054_v40, 0.0 }
 0x23f   :  { %997 = vmatpush.bf16.msra.mxu2 %v1941_v25  ;;  %721 = vadd.xlane.f32.xlu1 %v720_v56 }
 0x241   :  { %v1497_v60 = vpop.eup %1496 }
 0x242   :  { %v1499_v24 = vpop.eup %1498  ;;  %v744_v10 = vmul.f32 %v1497_v60, %v1990_v58  ;;  %v695_v52 = vpop.xlane.xlu1 %694 }
 0x243   :  { %v701_v11 = vpop.xlane.xlu0 %700  ;;  %v746_v12 = vmul.f32 %v1499_v24, %v1993_v47  ;;  %1500 = vrcp.f32 %v695_v52  ;;  %v698_v13 = vpop.xlane.xlu2 %697 }
 0x244   :  { %v760_v20 = vpack.c.bf16 %v744_v10, %v744_v10  ;;  %1502 = vrcp.f32 %v701_v11 }
 0x245   :  { %v762_v31 = vpack.c.bf16 %v746_v12, %v746_v12  ;;  %1504 = vrcp.f32 %v698_v13 }
 0x246   :  { %1358 = vmatmul.msk.bf16.vlgmr.msra.gmra.mxu1 %vm581_vm1, %v760_v20 }
 0x247   :  { %1360 = vmatmul.msk.bf16.vlgmr.msrb.gmra.mxu3 %vm581_vm1, %v762_v31  ;;  %978 = vmatpush.bf16.msra.mxu1 %v1945_v28 }
 0x248   :  { %1016 = vmatpush.bf16.msrb.mxu3 %v1948_v30 }
 0x249   :  { %v1501_v25 = vpop.eup %1500 }
 0x24a   :  { %v747_v58 = vmul.f32 %v1501_v25, %v2000_v50  ;;  %v1503_v17 = vpop.eup %1502 }
 0x24b   :  { %v704_v14 = vpop.xlane.xlu0 %703  ;;  %v749_v19 = vmul.f32 %v1503_v17, %v2006_v8  ;;  %v707_v32 = vpop.xlane.xlu2 %706 }
 0x24c   :  { %1506 = vrcp.f32 %v704_v14  ;;  %v763_v47 = vpack.c.bf16 %v747_v58, %v747_v58  ;;  %v1505_v33 = vpop.eup %1504 }
 0x24d   :  { %v765_v0 = vpack.c.bf16 %v749_v19, %v749_v19  ;;  %v713_v36 = vpop.xlane.xlu1 %712  ;;  %1508 = vrcp.f32 %v707_v32  ;;  %v748_v28 = vmul.f32 %v1505_v33, %v2003_v7 }
 0x24e   :  { %1361 = vmatmul.msk.bf16.vlgmr.msra.gmra.mxu0 %vm581_vm1, %v763_v47  ;;  %1510 = vrcp.f32 %v713_v36  ;;  %v1432_v36 = vld [vmem:[#allocation7 + $0x8] sm:$0xff] }
 0x24f   :  { %1035 = vmatpush.bf16.msra.mxu0 %v1951_v2  ;;  %1363 = vmatmul.msk.bf16.vlgmr.msrb.gmra.mxu2 %vm581_vm1, %v765_v0  ;;  %v764_v8 = vpack.c.bf16 %v748_v28, %v748_v28 }
 0x250   :  { %1073 = vmatpush.bf16.msrb.mxu2 %v1954_v3 }
 0x252   :  { %v1507_v30 = vpop.eup %1506 }
 0x253   :  { %v750_v50 = vmul.f32 %v1507_v30, %v2017_v16  ;;  %v710_v21 = vpop.xlane.xlu0 %709  ;;  %v1509_v37 = vpop.eup %1508 }
 0x254   :  { %v1511_v42 = vpop.eup %1510  ;;  %1512 = vrcp.f32 %v710_v21  ;;  %v751_v2 = vmul.f32 %v1509_v37, %v2015_v15 }
 0x255   :  { %v766_v39 = vpack.c.bf16 %v750_v50, %v750_v50  ;;  %v753_v7 = vmul.f32 %v1511_v42, %v2019_v18 }
 0x256   :  { %1362 = vmatmul.msk.bf16.vlgmr.msrb.gmra.mxu1 %vm581_vm1, %v764_v8  ;;  %v767_v3 = vpack.c.bf16 %v751_v2, %v751_v2 }
 0x257   :  { %1364 = vmatmul.msk.bf16.vlgmr.msra.gmra.mxu3 %vm581_vm1, %v766_v39  ;;  %1054 = vmatpush.bf16.msrb.mxu1 %v1965_v9  ;;  %v769_v44 = vpack.c.bf16 %v753_v7, %v753_v7 }
 0x258   :  { %1139 = vmatpush.bf16.msra.mxu3 %v1432_v36 }
 0x25a   :  { %v716_v43 = vpop.xlane.xlu1 %715  ;;  %v1513_v16 = vpop.eup %1512 }
 0x25b   :  { %1514 = vrcp.f32 %v716_v43  ;;  %v752_v38 = vmul.f32 %v1513_v16, %v2029_v41 }
 0x25d   :  { %v725_v45 = vpop.xlane.xlu2 %724  ;;  %v768_v15 = vpack.c.bf16 %v752_v38, %v752_v38 }
 0x25e   :  { %1365 = vmatmul.msk.bf16.vlgmr.msrb.gmra.mxu0 %vm581_vm1, %v767_v3  ;;  %1516 = vrcp.f32 %v725_v45 }
 0x25f   :  { %1367 = vmatmul.msk.bf16.vlgmr.msra.gmra.mxu2 %vm581_vm1, %v769_v44 }
 0x261   :  { %v1515_v4 = vpop.eup %1514 }
 0x262   :  { %v754_v9 = vmul.f32 %v1515_v4, %v2034_v51  ;;  %v719_v6 = vpop.xlane.xlu0 %718 }
 0x263   :  { %1518 = vrcp.f32 %v719_v6 }
 0x264   :  { %v770_v18 = vpack.c.bf16 %v754_v9, %v754_v9  ;;  %v1517_v55 = vpop.eup %1516 }
 0x265   :  { %v757_v34 = vmul.f32 %v1517_v55, %v2036_v54 }
 0x266   :  { %1366 = vmatmul.msk.bf16.vlgmr.msra.gmra.mxu1 %vm581_vm1, %v768_v15 }
 0x267   :  { %1368 = vmatmul.msk.bf16.vlgmr.msrb.gmra.mxu3 %vm581_vm1, %v770_v18  ;;  %v773_v57 = vpack.c.bf16 %v757_v34, %v757_v34 }
 0x269   :  { %v1519_v48 = vpop.eup %1518 }
 0x26a   :  { %v755_v41 = vmul.f32 %v1519_v48, %v2042_v35 }
 0x26c   :  { %v771_v53 = vpack.c.bf16 %v755_v41, %v755_v41  ;;  %v1431_v41 = vld [vmem:[#allocation7] sm:$0xff] }
 0x26d   :  { %1140 = vmatpush.bf16.msra.mxu3 %v1431_v41 }
 0x26e   :  { %1369 = vmatmul.msk.bf16.vlgmr.msra.gmra.mxu0 %vm581_vm1, %v771_v53 }
 0x26f   :  { %1371 = vmatmul.msk.bf16.vlgmr.msrb.gmra.mxu2 %vm581_vm1, %v773_v57 }
 0x2ad   :  { %v809_v51 = vpop.f32.mrf.mxu0 }
 0x2ae   :  { %v1080_v62 = vsel %vm139_vm0, %v809_v51, 0.0 }
 0x2b2   :  { %v722_v49 = vpop.xlane.xlu1 %721 }
 0x2b3   :  { %1520 = vrcp.f32 %v722_v49 }
 0x2b5   :  { %v811_v59 = vpop.f32.mrf.mxu0 }
 0x2b9   :  { %v1521_v46 = vpop.eup %1520  ;;  %v790_v61 = vpop.f32.mrf.mxu3 }
 0x2ba   :  { %v756_v63 = vmul.f32 %v1521_v46, %v2054_v40  ;;  %v1079_v54 = vsel %vm139_vm0, %v790_v61, 0.0 }
 0x2bb   :  { %v1081_v23 = vadd.f32 %v1080_v62, %v1079_v54  ;;  %v1434_v62 = vld [vmem:[#allocation9 + $0x8] sm:$0xff]  ;;  %v1442_v54 = vld [vmem:[%s2167_s14 + $0x38] sm:$0xff] }
 0x2bc   :  { %v772_v35 = vpack.c.bf16 %v756_v63, %v756_v63  ;;  %1189 = vmatpush.bf16.msrb.mxu0 %v1434_v62  ;;  %v1433_v63 = vld [vmem:[#allocation9] sm:$0xff]  ;;  %1268 = vmatpush.bf16.msra.mxu1 %v1442_v54 }
 0x2be   :  { %1370 = vmatmul.msk.bf16.vlgmr.msrb.gmra.mxu1 %vm581_vm1, %v772_v35  ;;  %v1440_v35 = vld [vmem:[%s2167_s14 + $0x28] sm:$0xff] }
 0x2c0   :  { %1190 = vmatpush.bf16.msrb.mxu0 %v1433_v63 }
 0x2c1   :  { %v792_v1 = vpop.f32.mrf.mxu3  ;;  %v847_v26 = vpop.f32.mrf.mxu2 }
 0x2c2   :  { %v1084_v29 = vsel %vm139_vm0, %v847_v26, 0.0  ;;  %v1439_v1 = vld [vmem:[%s2167_s14 + $0x20] sm:$0xff] }
 0x2c3   :  { %v828_v27 = vpop.f32.mrf.mxu1 }
 0x2c4   :  { %v1082_v5 = vsel %vm139_vm0, %v828_v27, 0.0  ;;  %v1455_v27 = vld [vmem:[%s2164_s11] ss:$0 sm:$0xff] }
 0x2c5   :  { %v1083_v22 = vadd.f32 %v1082_v5, %v1081_v23  ;;  %v1441_v23 = vld [vmem:[%s2167_s14 + $0x30] sm:$0xff] }
 0x2c6   :  { %1269 = vmatpush.bf16.msra.mxu1 %v1441_v23 }
 0x2c7   :  { %v1085_v56 = vadd.f32 %v1084_v29, %v1083_v22  ;;  %v1154_v22 = vstv %s1381_s0  ;;  %v1151_v29 = vstv %s1147_s17 }
 0x2c9   :  { %v849_v60 = vpop.f32.mrf.mxu2 }
 0x2ca   :  { %v866_v24 = vpop.f32.mrf.mxu3  ;;  %1270 = vmatpush.bf16.msra.mxu1 %v1440_v35  ;;  %v1522_v60 = vld [vmem:[%s2155_s2] sm:$0xff] }
 0x2cb   :  { %v1086_v10 = vsel %vm139_vm0, %v866_v24, 0.0  ;;  %v830_v40 = vpop.f32.mrf.mxu1  ;;  %v885_v52 = vpop.f32.mrf.mxu0  ;;  %v1155_v24 = vmul.f32 %v1522_v60, %v1154_v22 }
 0x2cc   :  { %v1087_v11 = vadd.f32 %v1086_v10, %v1085_v56  ;;  %v1088_v12 = vsel %vm139_vm0, %v885_v52, 0.0  ;;  %v1523_v10 = vld [vmem:[%s2155_s2 + $0x8] sm:$0xff] }
 0x2cd   :  { %v1156_v40 = vmul.f32 %v1523_v10, %v1154_v22 }
 0x2ce   :  { %v1089_v13 = vadd.f32 %v1088_v12, %v1087_v11  ;;  %1271 = vmatpush.bf16.msra.mxu1 %v1439_v1 }
 0x2d2   :  { %v868_v20 = vpop.f32.mrf.mxu3  ;;  %v923_v31 = vpop.f32.mrf.mxu2 }
 0x2d3   :  { %v887_v25 = vpop.f32.mrf.mxu0  ;;  %v904_v58 = vpop.f32.mrf.mxu1  ;;  %v1092_v47 = vsel %vm139_vm0, %v923_v31, 0.0 }
 0x2d4   :  { %v1090_v14 = vsel %vm139_vm0, %v904_v58, 0.0  ;;  %v1438_v25 = vld [vmem:[%s2167_s14 + $0x18] sm:$0xff]  ;;  %v1437_v58 = vld [vmem:[%s2167_s14 + $0x10] sm:$0xff] }
 0x2d5   :  { %v1091_v17 = vadd.f32 %v1090_v14, %v1089_v13  ;;  %1272 = vmatpush.bf16.msra.mxu1 %v1438_v25  ;;  %v1436_v14 = vld [vmem:[%s2167_s14 + $0x8] sm:$0xff] }
 0x2d7   :  { %v1093_v19 = vadd.f32 %v1092_v47, %v1091_v17  ;;  %v1435_v17 = vld [vmem:[%s2167_s14] sm:$0xff] }
 0x2d9   :  { %1273 = vmatpush.bf16.msra.mxu1 %v1437_v58 }
 0x2da   :  { %v942_v32 = vpop.f32.mrf.mxu3  ;;  %v925_v33 = vpop.f32.mrf.mxu2 }
 0x2db   :  { %v961_v0 = vpop.f32.mrf.mxu0  ;;  %v1094_v28 = vsel %vm139_vm0, %v942_v32, 0.0  ;;  %v906_v30 = vpop.f32.mrf.mxu1 }
 0x2dc   :  { %v1095_v50 = vsel %vm139_vm0, %v961_v0, 0.0 }
 0x2dd   :  { %v1096_v8 = vadd.f32 %v1095_v50, %v1094_v28  ;;  %1274 = vmatpush.bf16.msra.mxu1 %v1436_v14  ;;  %v1457_v50 = vld [vmem:[%s2168_s15] ss:$0 sm:$0xff]  ;;  %s1647_s15 = smov 128  }
 0x2e1   :  { %1275 = vmatpush.bf16.msra.mxu1 %v1435_v17 }
 0x2e2   :  { %v944_v39 = vpop.f32.mrf.mxu3  ;;  %v999_v21 = vpop.f32.mrf.mxu2 }
 0x2e3   :  { %v963_v37 = vpop.f32.mrf.mxu0  ;;  %v980_v42 = vpop.f32.mrf.mxu1  ;;  %v1099_v43 = vsel %vm139_vm0, %v999_v21, 0.0  ;;  %v1282_v39 = vstv %s1382_s5  ;;  %v1285_v21 = vstv %s1383_s7 }
 0x2e4   :  { %v1097_v2 = vsel %vm139_vm0, %v980_v42, 0.0 }
 0x2e5   :  { %v1098_v7 = vadd.f32 %v1097_v2, %v1096_v8 }
 0x2e7   :  { %v1100_v3 = vadd.f32 %v1099_v43, %v1098_v7 }
 0x2ea   :  { %v1018_v16 = vpop.f32.mrf.mxu3  ;;  %v1001_v44 = vpop.f32.mrf.mxu2 }
 0x2eb   :  { %v1101_v45 = vsel %vm139_vm0, %v1018_v16, 0.0  ;;  %v1037_v38 = vpop.f32.mrf.mxu0  ;;  %v982_v9 = vpop.f32.mrf.mxu1 }
 0x2ec   :  { %v1102_v4 = vadd.f32 %v1101_v45, %v1100_v3  ;;  %v1103_v6 = vsel %vm139_vm0, %v1037_v38, 0.0 }
 0x2ee   :  { %v1104_v15 = vadd.f32 %v1103_v6, %v1102_v4 }
 0x2f2   :  { %v1020_v18 = vpop.f32.mrf.mxu3  ;;  %v1075_v55 = vpop.f32.mrf.mxu2 }
 0x2f3   :  { %v1039_v48 = vpop.f32.mrf.mxu0  ;;  %v1107_v49 = vsel %vm139_vm0, %v1075_v55, 0.0 }
 0x2fa   :  { %v1077_v34 = vpop.f32.mrf.mxu2 }
 0x33b   :  { %v1056_v53 = vpop.f32.mrf.mxu1 }
 0x33c   :  { %v1105_v57 = vsel %vm139_vm0, %v1056_v53, 0.0 }
 0x33d   :  { %v1106_v51 = vadd.f32 %v1105_v57, %v1104_v15 }
 0x33f   :  { %v1108_v59 = vadd.f32 %v1107_v49, %v1106_v51 }
 0x341   :  { %v1109_v46 = vpack.c.bf16 %v1108_v59, %v1093_v19  ;;  %v1456_v19 = vld [vmem:[%s2166_s13] ss:$0 sm:$0xff]  ;;  %s1646_s13 = smov [#allocation10]  }
 0x342   :  { %s1296_s14 = sshll.u32 %s1646_s13, 4  ;;  %s1297_s14 = int_to_ptr.vmem [resolvable:$true] %s1296_s14 }
 0x343   :  { %v1058_v61 = vpop.f32.mrf.mxu1  ;;  %1380 = vmatmul.msk.bf16.vlgmr.msra.gmra.mxu3 %vm139_vm0, %v1109_v46 }
 0x3c6   :  { %v1142_v26 = vpop.f32.mrf.mxu3 }
 0x3c7   :  { %v1143_v5 = vadd.f32 %v1455_v27, %v1142_v26 }
 0x3c9   :  { %v1152_v52 = vmul.f32 %v1151_v29, %v1143_v5 }
 0x3cb   :  { %v1157_v13 = vadd.f32 %v1155_v24, %v1152_v52 }
 0x3cd   :  { %v1283_v42 = vmul.f32 %v1282_v39, %v1157_v13 }
 0x3ce   :  { %v1144_v56 = vpop.f32.mrf.mxu3 }
 0x3cf   :  { %v1145_v11 = vadd.f32 %v1455_v27, %v1144_v56 }
 0x3d1   :  { %v1153_v12 = vmul.f32 %v1151_v29, %v1145_v11 }
 0x3d3   :  { %v1158_v20 = vadd.f32 %v1156_v40, %v1153_v12 }
 0x3d5   :  { %v1159_v31 = vpack.c.bf16 %v1158_v20, %v1157_v13  ;;  %v1284_v16 = vmul.f32 %v1282_v39, %v1158_v20 }
 0x3d7   :  { %1392 = vmatmul.msk.bf16.vlgmr.msrb.gmra.mxu0 %vm139_vm0, %v1159_v31 }
 0x454   :  { %v1192_v47 = vpop.f32.mrf.mxu0 }
 0x455   :  { %v1193_v32 = vadd.f32 %v1456_v19, %v1192_v47 }
 0x457   :  { %v1197_v36 = vmax.f32 %v1193_v32, 0.0 }
 0x45c   :  { %v1194_v33 = vpop.f32.mrf.mxu0 }
 0x45d   :  { %v1195_v0 = vadd.f32 %v1456_v19, %v1194_v33 }
 0x45f   :  { %v1198_v28 = vmax.f32 %v1195_v0, 0.0 }
 0x461   :  { %v1199_v30 = vpack.c.bf16 %v1198_v28, %v1197_v36 }
 0x463   :  { %1276 = vmatmul.bf16.vlgmr.msra.gmra.mxu1 %v1199_v30 }
 0x4e0   :  { %v1277_v8 = vpop.f32.mrf.mxu1 }
 0x4e1   :  { %v1278_v37 = vadd.f32 %v1457_v50, %v1277_v8 }
 0x4e3   :  { %v1286_v2 = vmul.f32 %v1285_v21, %v1278_v37 }
 0x4e5   :  { %v1288_v7 = vadd.f32 %v1286_v2, %v1283_v42 }
 0x4e7   :  { %1290 = vst.msk [vmem:[#allocation10] sm:$0xff] %vm139_vm0, %v1288_v7 }
 0x4e8   :  { %v1279_v43 = vpop.f32.mrf.mxu1 }
 0x4e9   :  { %v1280_v3 = vadd.f32 %v1457_v50, %v1279_v43 }
 0x4eb   :  { %v1287_v44 = vmul.f32 %v1285_v21, %v1280_v3 }
 0x4ed   :  { %v1289_v45 = vadd.f32 %v1287_v44, %v1284_v16 }
 0x4ef   :  { %1291 = vst.msk [vmem:[#allocation10 + $0x8] sm:$0xff] %vm139_vm0, %v1289_v45 }
 0x4f0   :  { %1304 = dma.vmem_to_hbm [thread:$0]  %s1297_s14, 256, %s1299_s29, [#allocation4], %s1647_s15, %s1647_s15, %s1648_s16  }
 0x4f1   :  { %1638 = dma.done.wait [#allocation4], 256  }
 0x4f2   :  { %1639 = vsyncadd [#allocation4], 4294967040 }
 0x4f3   :  { %1309 = vsyncpa [#allocation3], 1 }
 0x4f4   :  { %1310 = vsyncpa [#allocation8], 1 }
 0x4f5   :  { %1311 = vsyncpa [#allocation4], 1 }
 0x4f6   :  { %1312 = vsyncpa [#allocation5], 1 }

// kernel: tpu_custom_call.1
= control target key start
LH: loop header
LB: loop body
LE: loop exit
PB: predicated region body
PF: predicated region fallthrough
CT: control target
= control target key end

     0   :  { %s2153_s0 = inlined_call_operand.hbm [shape: f32[4], index: 0, kind: input, shape index: {}]   ;;  %s2154_s1 = inlined_call_operand.vmem [shape: f32[16,32], index: 1, kind: input, shape index: {}]   ;;  %s2155_s2 = inlined_call_operand.vmem [shape: f32[16,32], index: 2, kind: input, shape index: {}]   ;;  %s2156_s3 = inlined_call_operand.hbm [shape: f32[8,32], index: 3, kind: input, shape index: {}]   ;;  %s2157_s4 = inlined_call_operand.vmem [shape: bf16[32,32], index: 4, kind: input, shape index: {}]   ;;  %s2158_s5 = inlined_call_operand.vmem [shape: f32[1,32], index: 5, kind: input, shape index: {}]   ;;  %s2159_s6 = inlined_call_operand.vmem [shape: bf16[32,32], index: 6, kind: input, shape index: {}]   ;;  %s2160_s7 = inlined_call_operand.vmem [shape: f32[1,32], index: 7, kind: input, shape index: {}]   ;;  %s2161_s8 = inlined_call_operand.vmem [shape: bf16[32,32], index: 8, kind: input, shape index: {}]   ;;  %s2162_s9 = inlined_call_operand.vmem [shape: f32[1,32], index: 9, kind: input, shape index: {}]   ;;  %s2163_s10 = inlined_call_operand.hbm [shape: bf16[32,32], index: 10, kind: input, shape index: {}]   ;;  %s2164_s11 = inlined_call_operand.vmem [shape: f32[1,32], index: 11, kind: input, shape index: {}]   ;;  %s2165_s12 = inlined_call_operand.hbm [shape: bf16[32,128], index: 12, kind: input, shape index: {}]   ;;  %s2166_s13 = inlined_call_operand.vmem [shape: f32[1,128], index: 13, kind: input, shape index: {}]   ;;  %s2167_s14 = inlined_call_operand.vmem [shape: bf16[128,32], index: 14, kind: input, shape index: {}]   ;;  %s2168_s15 = inlined_call_operand.vmem [shape: f32[1,32], index: 15, kind: input, shape index: {}]   ;;  %s2169_s16 = inlined_call_operand.hbm [shape: f32[16,32], index: 16, kind: output, shape index: {}]  }
   0x1   :  { %2170 = sst [smem:[#allocation15_spill]] %s2153_s0 }
   0x2   :  { %2171 = sst [smem:[#allocation16_spill]] %s2169_s16 }
   0x3   :  { %21 = vsyncpa [#allocation5], 0 }
   0x4   :  { %22 = vsyncpa [#allocation3], 0 }
   0x5   :  { %23 = vsyncpa [#allocation8], 0  ;;  %s65_s23 = sshll.u32 %s2163_s10, 4  ;;  %s66_s23 = int_to_ptr.hbm [resolvable:$true] %s65_s23 }
   0x6   :  { %24 = vsyncpa [#allocation4], 0  ;;  %s1640_s24 = smov [#allocation7]   ;;  %s2172_s28 = sld [smem:[#allocation15_spill]] }
   0x7   :  { %s67_s25 = sshll.u32 %s1640_s24, 4  ;;  %s1641_s30 = smov 64   ;;  %s68_s25 = int_to_ptr.vmem [resolvable:$true] %s67_s25 }
   0x8   :  { %s1642_s0 = smov 4   ;;  %s1643_s17 = smov [#allocation2]  }
   0x9   :  { %73 = dma.hbm_to_vmem [thread:$0]  %s66_s23, 256, %s68_s25, [#allocation8], %s1641_s30, %s1641_s30, %s1642_s0  }
   0xa   :  { %s43_s20 = sshll.u32 %s2156_s3, 4  ;;  %s1644_s10 = smov [#allocation6]   ;;  %s44_s20 = int_to_ptr.hbm [resolvable:$true] %s43_s20 }
   0xb   :  { %s45_s21 = sshll.u32 %s1644_s10, 4  ;;  %s80_s16 = sshll.u32 %s2165_s12, 4  ;;  %s46_s21 = int_to_ptr.vmem [resolvable:$true] %s45_s21  ;;  %s81_s16 = int_to_ptr.hbm [resolvable:$true] %s80_s16 }
   0xc   :  { %s30_s29 = sshll.u32 %s2172_s28, 4  ;;  %s1645_s26 = smov [#allocation9]   ;;  %s31_s29 = int_to_ptr.hbm [resolvable:$true] %s30_s29 }
   0xd   :  { %33 = dma.hbm_to_smem %s31_s29, 16, %s1643_s17, [#allocation5]  }
   0xe   :  { %48 = dma.hbm_to_vmem [thread:$0]  %s44_s20, 128, %s46_s21, [#allocation3]  }
   0xf   :  { %s82_s27 = sshll.u32 %s1645_s26, 4  ;;  %s83_s27 = int_to_ptr.vmem [resolvable:$true] %s82_s27 }
  0x10   :  { %88 = dma.hbm_to_vmem [thread:$0]  %s81_s16, 256, %s83_s27, [#allocation8], %s1641_s30, %s1641_s30, %s1642_s0  }
  0x11   :  { %1632 = dma.done.wait [#allocation5], 16  }
  0x12   :  { %1633 = vsyncadd [#allocation5], 4294967280 }
  0x13   :  { %1634 = dma.done.wait [#allocation3], 128  }
  0x14   :  { %1635 = vsyncadd [#allocation3], 4294967168 }
  0x15   :  { %1636 = dma.done.wait [#allocation8], 512  }
  0x16   :  { %1637 = vsyncadd [#allocation8], 4294966784 }
  0x17   :  { %111 = sfence }
  0x18   :  { %v1428_v0 = vld [vmem:[%s2159_s6 + $0x8] sm:$0xff]  ;;  %v1427_v1 = vld [vmem:[%s2159_s6] sm:$0xff]  ;;  %vm139_vm0 = vcmask 261120   ;;  %vm581_vm1 = vcmask 64512   ;;  %vm777_vm2 = vcmask 1043456   ;;  %s1381_s0 = sld [smem:[#allocation2 + $0x1]] }
  0x19   :  { %v113_v2 = vld [vmem:[%s2155_s2] sm:$0xff]  ;;  %v1426_v3 = vld [vmem:[%s2157_s4 + $0x8] sm:$0xff]  ;;  %186 = vmatpush.bf16.msra.mxu2 %v1428_v0  ;;  %s1147_s17 = sld [smem:[#allocation2]]  ;;  %s1648_s16 = smov 8  }
  0x1a   :  { %v114_v4 = vld [vmem:[%s2155_s2 + $0x8] sm:$0xff]  ;;  %v1425_v5 = vld [vmem:[%s2157_s4] sm:$0xff]  ;;  %149 = vmatpush.bf16.msra.mxu0 %v1426_v3  ;;  %s2173_s12 = sld [smem:[#allocation16_spill]] }
  0x1b   :  { %v115_v6 = vld [vmem:[%s2154_s1] sm:$0xff]  ;;  %v116_v7 = vld [vmem:[%s2154_s1 + $0x8] sm:$0xff]  ;;  %v118_v9 = vpack.c.bf16 %v114_v4, %v113_v2 }
  0x1c   :  { %v1430_v8 = vld [vmem:[%s2161_s8 + $0x8] sm:$0xff]  ;;  %v117_v10 = vpack.c.bf16 %v116_v7, %v115_v6  ;;  %v1429_v11 = vld [vmem:[%s2161_s8] sm:$0xff] }
  0x1d   :  { %187 = vmatpush.bf16.msra.mxu2 %v1427_v1  ;;  %v228_v12 = vld [vmem:[#allocation6] sm:$0xff] }
  0x1e   :  { %150 = vmatpush.bf16.msra.mxu0 %v1425_v5  ;;  %v230_v13 = vrot.slane %v228_v12, 1  ;;  %v231_v14 = vrot.slane %v228_v12, 2  ;;  %v232_v15 = vrot.slane %v228_v12, 3  ;;  %v233_v16 = vrot.slane %v228_v12, 4  ;;  %v1452_v20 = vld [vmem:[%s2160_s7] ss:$0 sm:$0xff] }
  0x1f   :  { %v234_v17 = vrot.slane %v228_v12, 5  ;;  %v235_v18 = vrot.slane %v228_v12, 6  ;;  %v236_v19 = vrot.slane %v228_v12, 7  ;;  %v1785_v21 = vld [vmem:[%s2158_s5] ss:$0 sm:$0xff]  ;;  %v1787_v22 = vperm.slane %v228_v12, 0 }
  0x20   :  { %1330 = vmatmul.msk.bf16.vlgmr.msra.gmra.mxu2 %vm139_vm0, %v118_v9  ;;  %v1789_v23 = vperm.slane %v230_v13, 0  ;;  %v1791_v24 = vperm.slane %v231_v14, 0  ;;  %v1793_v25 = vperm.slane %v232_v15, 0  ;;  %v1795_v27 = vperm.slane %v233_v16, 0  ;;  %s1382_s5 = sld [smem:[#allocation2 + $0x2]]  ;;  %s1298_s29 = sshll.u32 %s2173_s12, 4  ;;  %s1299_s29 = int_to_ptr.hbm [resolvable:$true] %s1298_s29 }
  0x21   :  { %220 = vmatpush.bf16.msrb.mxu2 %v1430_v8  ;;  %1321 = vmatmul.msk.bf16.vlgmr.msra.gmra.mxu0 %vm139_vm0, %v117_v10  ;;  %v1797_v28 = vperm.slane %v234_v17, 0  ;;  %v1799_v29 = vperm.slane %v235_v18, 0  ;;  %v1801_v30 = vperm.slane %v236_v19, 0  ;;  %s1383_s7 = sld [smem:[#allocation2 + $0x3]] }
  0x25   :  { %221 = vmatpush.bf16.msrb.mxu2 %v1429_v11 }
  0x30   :  { %1339 = vmatmul.msk.bf16.vlgmr.msrb.gmra.mxu2 %vm139_vm0, %v118_v9 }
  0x9e   :  { %v152_v32 = vpop.f32.mrf.mxu0 }
  0x9f   :  { %v153_v33 = vadd.f32 %v1785_v21, %v152_v32 }
  0xa1   :  { %v285_v60 = vpack.c.bf16 %v153_v33, %v153_v33 }
  0xa3   :  { %v189_v26 = vpop.f32.mrf.mxu2 }
  0xa4   :  { %v190_v31 = vadd.f32 %v1452_v20, %v189_v26 }
  0xa6   :  { %v253_v34 = vmul.f32 %v1787_v22, %v190_v31  ;;  %v254_v35 = vmul.f32 %v1789_v23, %v190_v31  ;;  %v255_v36 = vmul.f32 %v1791_v24, %v190_v31  ;;  %v256_v37 = vmul.f32 %v1793_v25, %v190_v31  ;;  %v154_v26 = vpop.f32.mrf.mxu0 }
  0xa7   :  { %v257_v38 = vmul.f32 %v1795_v27, %v190_v31  ;;  %v258_v39 = vmul.f32 %v1797_v28, %v190_v31  ;;  %v259_v40 = vmul.f32 %v1799_v29, %v190_v31  ;;  %v260_v41 = vmul.f32 %v1801_v30, %v190_v31 }
  0xa8   :  { %v287_v42 = vpack.c.bf16 %v253_v34, %v253_v34  ;;  %v288_v43 = vpack.c.bf16 %v254_v35, %v254_v35  ;;  %v289_v44 = vpack.c.bf16 %v255_v36, %v255_v36  ;;  %v290_v45 = vpack.c.bf16 %v256_v37, %v256_v37 }
  0xa9   :  { %v291_v46 = vpack.c.bf16 %v257_v38, %v257_v38  ;;  %v292_v47 = vpack.c.bf16 %v258_v39, %v258_v39  ;;  %v293_v48 = vpack.c.bf16 %v259_v40, %v259_v40  ;;  %v294_v49 = vpack.c.bf16 %v260_v41, %v260_v41 }
  0xaa   :  { %v323_v50 = vsel %vm139_vm0, %v287_v42, 0  ;;  %v339_v51 = vsel %vm139_vm0, %v288_v43, 0  ;;  %v355_v52 = vsel %vm139_vm0, %v289_v44, 0  ;;  %v371_v53 = vsel %vm139_vm0, %v290_v45, 0 }
  0xab   :  { %v191_v54 = vpop.f32.mrf.mxu2  ;;  %332 = vmatpush.bf16.xpose.msra.mxu3 %v323_v50  ;;  %348 = vmatpush.bf16.xpose.msrb.mxu0 %v339_v51  ;;  %v387_v55 = vsel %vm139_vm0, %v291_v46, 0  ;;  %v403_v56 = vsel %vm139_vm0, %v292_v47, 0  ;;  %v419_v57 = vsel %vm139_vm0, %v293_v48, 0  ;;  %v435_v58 = vsel %vm139_vm0, %v294_v49, 0 }
  0xac   :  { %v192_v59 = vadd.f32 %v1452_v20, %v191_v54  ;;  %364 = vmatpush.bf16.xpose.msra.mxu1 %v355_v52  ;;  %380 = vmatpush.bf16.xpose.msra.mxu2 %v371_v53  ;;  %v155_v31 = vadd.f32 %v1785_v21, %v154_v26  ;;  %v1454_v53 = vld [vmem:[%s2162_s9] ss:$0 sm:$0xff] }
  0xae   :  { %v261_v61 = vmul.f32 %v1787_v22, %v192_v59  ;;  %v262_v62 = vmul.f32 %v1789_v23, %v192_v59  ;;  %v263_v63 = vmul.f32 %v1791_v24, %v192_v59  ;;  %v264_v0 = vmul.f32 %v1793_v25, %v192_v59 }
  0xaf   :  { %v265_v9 = vmul.f32 %v1795_v27, %v192_v59  ;;  %v266_v10 = vmul.f32 %v1797_v28, %v192_v59  ;;  %v267_v11 = vmul.f32 %v1799_v29, %v192_v59  ;;  %v268_v12 = vmul.f32 %v1801_v30, %v192_v59 }
  0xb0   :  { %v295_v1 = vpack.c.bf16 %v261_v61, %v261_v61  ;;  %v296_v2 = vpack.c.bf16 %v262_v62, %v262_v62  ;;  %v297_v3 = vpack.c.bf16 %v263_v63, %v263_v63  ;;  %v298_v4 = vpack.c.bf16 %v264_v0, %v264_v0 }
  0xb1   :  { %v299_v13 = vpack.c.bf16 %v265_v9, %v265_v9  ;;  %v300_v14 = vpack.c.bf16 %v266_v10, %v266_v10  ;;  %v301_v15 = vpack.c.bf16 %v267_v11, %v267_v11  ;;  %v302_v16 = vpack.c.bf16 %v268_v12, %v268_v12 }
  0xb2   :  { %1340 = vmatmul.msk.bf16.vlgmr.msra.gmra.mxu3 %vm139_vm0, %v285_v60  ;;  %1341 = vmatmul.msk.bf16.vlgmr.msrb.gmra.mxu0 %vm139_vm0, %v285_v60  ;;  %v454_v5 = vsel %vm139_vm0, %v295_v1, 0  ;;  %v470_v6 = vsel %vm139_vm0, %v296_v2, 0  ;;  %v486_v7 = vsel %vm139_vm0, %v297_v3, 0  ;;  %v502_v8 = vsel %vm139_vm0, %v298_v4, 0 }
  0xb3   :  { %396 = vmatpush.bf16.xpose.msrb.mxu3 %v387_v55  ;;  %412 = vmatpush.bf16.xpose.msra.mxu0 %v403_v56  ;;  %v518_v17 = vsel %vm139_vm0, %v299_v13, 0  ;;  %v534_v18 = vsel %vm139_vm0, %v300_v14, 0  ;;  %v550_v19 = vsel %vm139_vm0, %v301_v15, 0  ;;  %v566_v20 = vsel %vm139_vm0, %v302_v16, 0  ;;  %v223_v33 = vpop.f32.mrf.mxu2 }
  0xb4   :  { %428 = vmatpush.bf16.xpose.msrb.mxu1 %v419_v57  ;;  %444 = vmatpush.bf16.xpose.msrb.mxu2 %v435_v58  ;;  %v286_v32 = vpack.c.bf16 %v155_v31, %v155_v31  ;;  %v224_v56 = vadd.f32 %v1454_v53, %v223_v33 }
  0xb5   :  { %1342 = vmatmul.msk.bf16.vlgmr.msra.gmra.mxu1 %vm139_vm0, %v285_v60  ;;  %1343 = vmatmul.msk.bf16.vlgmr.msra.gmra.mxu2 %vm139_vm0, %v285_v60 }
  0xb6   :  { %v269_v61 = vmul.f32 %v1787_v22, %v224_v56  ;;  %v270_v62 = vmul.f32 %v1789_v23, %v224_v56  ;;  %v271_v63 = vmul.f32 %v1791_v24, %v224_v56  ;;  %v272_v2 = vmul.f32 %v1793_v25, %v224_v56 }
  0xb7   :  { %v273_v3 = vmul.f32 %v1795_v27, %v224_v56  ;;  %v274_v4 = vmul.f32 %v1797_v28, %v224_v56  ;;  %v275_v11 = vmul.f32 %v1799_v29, %v224_v56  ;;  %v276_v15 = vmul.f32 %v1801_v30, %v224_v56 }
  0xb9   :  { %v307_v9 = vpack.c.bf16 %v273_v3, %v273_v3  ;;  %v308_v10 = vpack.c.bf16 %v274_v4, %v274_v4  ;;  %v310_v26 = vpack.c.bf16 %v276_v15, %v276_v15 }
  0xbb   :  { %463 = vmatpush.bf16.xpose.msra.mxu3 %v454_v5  ;;  %479 = vmatpush.bf16.xpose.msrb.mxu0 %v470_v6  ;;  %v1853_v34 = vpop.f32.mrf.mxu2  ;;  %v303_v5 = vpack.c.bf16 %v269_v61, %v269_v61  ;;  %v304_v6 = vpack.c.bf16 %v270_v62, %v270_v62 }
  0xbc   :  { %495 = vmatpush.bf16.xpose.msra.mxu1 %v486_v7  ;;  %511 = vmatpush.bf16.xpose.msra.mxu2 %v502_v8  ;;  %v305_v7 = vpack.c.bf16 %v271_v63, %v271_v63  ;;  %v306_v8 = vpack.c.bf16 %v272_v2, %v272_v2 }
  0xbd   :  { %v779_v12 = vsel %vm777_vm2, %v303_v5, 0  ;;  %v798_v13 = vsel %vm777_vm2, %v304_v6, 0 }
  0xbe   :  { %v817_v14 = vsel %vm777_vm2, %v305_v7, 0  ;;  %v836_v16 = vsel %vm777_vm2, %v306_v8, 0 }
  0xc2   :  { %1344 = vmatmul.msk.bf16.vlgmr.msrb.gmra.mxu3 %vm139_vm0, %v285_v60  ;;  %1345 = vmatmul.msk.bf16.vlgmr.msra.gmra.mxu0 %vm139_vm0, %v285_v60 }
  0xc3   :  { %527 = vmatpush.bf16.xpose.msrb.mxu3 %v518_v17  ;;  %543 = vmatpush.bf16.xpose.msra.mxu0 %v534_v18  ;;  %v855_v17 = vsel %vm777_vm2, %v307_v9, 0  ;;  %v874_v18 = vsel %vm777_vm2, %v308_v10, 0 }
  0xc5   :  { %1346 = vmatmul.msk.bf16.vlgmr.msrb.gmra.mxu1 %vm139_vm0, %v285_v60  ;;  %1347 = vmatmul.msk.bf16.vlgmr.msrb.gmra.mxu2 %vm139_vm0, %v285_v60 }
  0xc6   :  { %559 = vmatpush.bf16.xpose.msrb.mxu1 %v550_v19  ;;  %575 = vmatpush.bf16.xpose.msrb.mxu2 %v566_v20  ;;  %v309_v19 = vpack.c.bf16 %v275_v11, %v275_v11 }
  0xc8   :  { %v893_v33 = vsel %vm777_vm2, %v309_v19, 0 }
  0xd2   :  { %1348 = vmatmul.msk.bf16.vlgmr.msra.gmra.mxu3 %vm139_vm0, %v286_v32  ;;  %1349 = vmatmul.msk.bf16.vlgmr.msrb.gmra.mxu0 %vm139_vm0, %v286_v32 }
  0xd3   :  { %788 = vmatpush.bf16.msra.mxu3 %v779_v12  ;;  %807 = vmatpush.bf16.msrb.mxu0 %v798_v13 }
  0xd5   :  { %1350 = vmatmul.msk.bf16.vlgmr.msra.gmra.mxu1 %vm139_vm0, %v286_v32  ;;  %1351 = vmatmul.msk.bf16.vlgmr.msra.gmra.mxu2 %vm139_vm0, %v286_v32 }
  0xd6   :  { %826 = vmatpush.bf16.msra.mxu1 %v817_v14  ;;  %845 = vmatpush.bf16.msra.mxu2 %v836_v16 }
  0xe2   :  { %1352 = vmatmul.msk.bf16.vlgmr.msrb.gmra.mxu3 %vm139_vm0, %v286_v32  ;;  %1353 = vmatmul.msk.bf16.vlgmr.msra.gmra.mxu0 %vm139_vm0, %v286_v32 }
  0xe3   :  { %864 = vmatpush.bf16.msrb.mxu3 %v855_v17  ;;  %883 = vmatpush.bf16.msra.mxu0 %v874_v18 }
  0xe5   :  { %1354 = vmatmul.msk.bf16.vlgmr.msrb.gmra.mxu1 %vm139_vm0, %v286_v32  ;;  %1355 = vmatmul.msk.bf16.vlgmr.msrb.gmra.mxu2 %vm139_vm0, %v286_v32 }
  0xe6   :  { %902 = vmatpush.bf16.msrb.mxu1 %v893_v33 }
 0x12f   :  { %v1855_v21 = vpop.f32.mrf.mxu0 }
 0x130   :  { %v585_v36 = vsel %vm581_vm1, %v1855_v21, -inf }
 0x131   :  { %586 = vmax.xlane.f32.xlu1 %v585_v36 }
 0x132   :  { %v1857_v35 = vpop.f32.mrf.mxu1 }
 0x133   :  { %v588_v42 = vsel %vm581_vm1, %v1857_v35, -inf }
 0x135   :  { %v1861_v37 = vpop.f32.mrf.mxu3 }
 0x136   :  { %v582_v39 = vsel %vm581_vm1, %v1861_v37, -inf }
 0x137   :  { %v352_v40 = vpop.f32.mrf.mxu0  ;;  %583 = vmax.xlane.f32.xlu0 %v582_v39 }
 0x138   :  { %v1863_v38 = vpop.f32.mrf.mxu2  ;;  %v912_v40 = vsel %vm777_vm2, %v310_v26, 0 }
 0x139   :  { %589 = vmax.xlane.f32.xlu1 %v588_v42  ;;  %v591_v45 = vsel %vm581_vm1, %v1863_v38, -inf  ;;  %921 = vmatpush.bf16.msrb.mxu2 %v912_v40  ;;  %v226_v42 = vadd.f32 %v1454_v53, %v1853_v34 }
 0x13a   :  { %v368_v41 = vpop.f32.mrf.mxu1 }
 0x13b   :  { %v281_v34 = vmul.f32 %v1795_v27, %v226_v42  ;;  %v282_v53 = vmul.f32 %v1797_v28, %v226_v42  ;;  %v283_v27 = vmul.f32 %v1799_v29, %v226_v42 }
 0x13d   :  { %v336_v43 = vpop.f32.mrf.mxu3  ;;  %v315_v63 = vpack.c.bf16 %v281_v34, %v281_v34  ;;  %v317_v5 = vpack.c.bf16 %v283_v27, %v283_v27 }
 0x13f   :  { %v1871_v46 = vpop.f32.mrf.mxu0  ;;  %592 = vmax.xlane.f32.xlu0 %v591_v45  ;;  %v1965_v9 = vsel %vm777_vm2, %v317_v5, 0 }
 0x140   :  { %v384_v44 = vpop.f32.mrf.mxu2  ;;  %v597_v51 = vsel %vm581_vm1, %v1871_v46, -inf }
 0x142   :  { %v1873_v47 = vpop.f32.mrf.mxu1 }
 0x143   :  { %v600_v48 = vsel %vm581_vm1, %v1873_v47, -inf }
 0x144   :  { %601 = vmax.xlane.f32.xlu1 %v600_v48 }
 0x145   :  { %v1877_v49 = vpop.f32.mrf.mxu3 }
 0x146   :  { %v594_v52 = vsel %vm581_vm1, %v1877_v49, -inf }
 0x147   :  { %v416_v54 = vpop.f32.mrf.mxu0  ;;  %598 = vmax.xlane.f32.xlu0 %v597_v51  ;;  %595 = vmax.xlane.f32.xlu2 %v594_v52  ;;  %v278_v51 = vmul.f32 %v1789_v23, %v226_v42  ;;  %v277_v52 = vmul.f32 %v1787_v22, %v226_v42  ;;  %v316_v23 = vpack.c.bf16 %v282_v53, %v282_v53 }
 0x148   :  { %v1879_v50 = vpop.f32.mrf.mxu2  ;;  %v280_v54 = vmul.f32 %v1793_v25, %v226_v42 }
 0x149   :  { %v603_v59 = vsel %vm581_vm1, %v1879_v50, -inf  ;;  %v1951_v2 = vsel %vm777_vm2, %v316_v23, 0 }
 0x14a   :  { %v432_v55 = vpop.f32.mrf.mxu1  ;;  %v314_v61 = vpack.c.bf16 %v280_v54, %v280_v54 }
 0x14b   :  { %v279_v55 = vmul.f32 %v1791_v24, %v226_v42 }
 0x14c   :  { %v1941_v25 = vsel %vm777_vm2, %v314_v61, 0 }
 0x14d   :  { %v400_v57 = vpop.f32.mrf.mxu3  ;;  %v313_v62 = vpack.c.bf16 %v279_v55, %v279_v55 }
 0x14e   :  { %v284_v57 = vmul.f32 %v1801_v30, %v226_v42  ;;  %v1948_v30 = vsel %vm777_vm2, %v315_v63, 0 }
 0x14f   :  { %v1890_v60 = vpop.f32.mrf.mxu0  ;;  %604 = vmax.xlane.f32.xlu2 %v603_v59  ;;  %v311_v59 = vpack.c.bf16 %v277_v52, %v277_v52  ;;  %v1945_v28 = vsel %vm777_vm2, %v313_v62, 0 }
 0x150   :  { %v448_v58 = vpop.f32.mrf.mxu2  ;;  %v609_v1 = vsel %vm581_vm1, %v1890_v60, -inf }
 0x151   :  { %610 = vmax.xlane.f32.xlu1 %v609_v1  ;;  %v312_v58 = vpack.c.bf16 %v278_v51, %v278_v51  ;;  %v318_v1 = vpack.c.bf16 %v284_v57, %v284_v57  ;;  %v1938_v24 = vsel %vm777_vm2, %v311_v59, 0 }
 0x152   :  { %v1895_v0 = vpop.f32.mrf.mxu1 }
 0x153   :  { %v612_v45 = vsel %vm581_vm1, %v1895_v0, -inf  ;;  %v1935_v22 = vsel %vm777_vm2, %v312_v58, 0  ;;  %v1954_v3 = vsel %vm777_vm2, %v318_v1, 0 }
 0x155   :  { %v1910_v20 = vpop.f32.mrf.mxu3 }
 0x156   :  { %v606_v32 = vsel %vm581_vm1, %v1910_v20, -inf }
 0x157   :  { %v483_v36 = vpop.f32.mrf.mxu0  ;;  %607 = vmax.xlane.f32.xlu2 %v606_v32 }
 0x158   :  { %v1912_v31 = vpop.f32.mrf.mxu2 }
 0x159   :  { %v615_v39 = vsel %vm581_vm1, %v1912_v31, -inf }
 0x15a   :  { %v499_v41 = vpop.f32.mrf.mxu1  ;;  %616 = vmax.xlane.f32.xlu0 %v615_v39 }
 0x15d   :  { %v467_v43 = vpop.f32.mrf.mxu3 }
 0x15f   :  { %v1923_v48 = vpop.f32.mrf.mxu0  ;;  %613 = vmax.xlane.f32.xlu2 %v612_v45 }
 0x160   :  { %v515_v44 = vpop.f32.mrf.mxu2  ;;  %v621_v13 = vsel %vm581_vm1, %v1923_v48, -inf }
 0x162   :  { %v1929_v56 = vpop.f32.mrf.mxu1 }
 0x163   :  { %v624_v55 = vsel %vm581_vm1, %v1929_v56, -inf }
 0x165   :  { %v1956_v4 = vpop.f32.mrf.mxu3 }
 0x166   :  { %v618_v29 = vsel %vm581_vm1, %v1956_v4, -inf }
 0x167   :  { %v547_v7 = vpop.f32.mrf.mxu0  ;;  %619 = vmax.xlane.f32.xlu0 %v618_v29 }
 0x168   :  { %v1958_v6 = vpop.f32.mrf.mxu2 }
 0x169   :  { %v627_v8 = vsel %vm581_vm1, %v1958_v6, -inf }
 0x16a   :  { %v563_v10 = vpop.f32.mrf.mxu1  ;;  %628 = vmax.xlane.f32.xlu2 %v627_v8 }
 0x16d   :  { %v531_v11 = vpop.f32.mrf.mxu3 }
 0x16f   :  { %622 = vmax.xlane.f32.xlu0 %v621_v13 }
 0x170   :  { %v579_v12 = vpop.f32.mrf.mxu2 }
 0x1a4   :  { %v587_v14 = vpop.xlane.xlu1 %586 }
 0x1a5   :  { %v631_v15 = vsub.f32 %v1855_v21, %v587_v14 }
 0x1a7   :  { %v648_v16 = vmul.f32 1.442695, %v631_v15 }
 0x1a9   :  { %1458 = vpow2.f32 %v648_v16 }
 0x1aa   :  { %v584_v17 = vpop.xlane.xlu0 %583 }
 0x1ab   :  { %v630_v18 = vsub.f32 %v1861_v37, %v584_v17 }
 0x1ac   :  { %v590_v33 = vpop.xlane.xlu1 %589 }
 0x1ad   :  { %v646_v19 = vmul.f32 1.442695, %v630_v18  ;;  %v632_v21 = vsub.f32 %v1857_v35, %v590_v33 }
 0x1af   :  { %v1971_v26 = vpop.eup %1458  ;;  %1460 = vpow2.f32 %v646_v19  ;;  %v650_v42 = vmul.f32 1.442695, %v632_v21 }
 0x1b0   :  { %v681_v32 = vsel %vm581_vm1, %v1971_v26, 0.0 }
 0x1b1   :  { %682 = vadd.xlane.f32.xlu0 %v681_v32 }
 0x1b2   :  { %v593_v36 = vpop.xlane.xlu0 %592 }
 0x1b3   :  { %v633_v39 = vsub.f32 %v1863_v38, %v593_v36 }
 0x1b5   :  { %v1976_v40 = vpop.eup %1460  ;;  %v652_v41 = vmul.f32 1.442695, %v633_v39 }
 0x1b6   :  { %v678_v37 = vsel %vm581_vm1, %v1976_v40, 0.0 }
 0x1b7   :  { %1462 = vpow2.f32 %v652_v41  ;;  %679 = vadd.xlane.f32.xlu1 %v678_v37  ;;  %v602_v45 = vpop.xlane.xlu1 %601 }
 0x1b8   :  { %1464 = vpow2.f32 %v650_v42  ;;  %v636_v35 = vsub.f32 %v1873_v47, %v602_v45 }
 0x1ba   :  { %v599_v43 = vpop.xlane.xlu0 %598  ;;  %v596_v44 = vpop.xlane.xlu2 %595  ;;  %v658_v57 = vmul.f32 1.442695, %v636_v35 }
 0x1bb   :  { %v634_v51 = vsub.f32 %v1877_v49, %v596_v44  ;;  %v635_v38 = vsub.f32 %v1871_v46, %v599_v43 }
 0x1bd   :  { %v1982_v52 = vpop.eup %1462  ;;  %v654_v54 = vmul.f32 1.442695, %v634_v51  ;;  %v656_v53 = vmul.f32 1.442695, %v635_v38 }
 0x1be   :  { %v687_v34 = vsel %vm581_vm1, %v1982_v52, 0.0  ;;  %v1990_v58 = vpop.eup %1464 }
 0x1bf   :  { %625 = vmax.xlane.f32.xlu1 %v624_v55  ;;  %688 = vadd.xlane.f32.xlu2 %v687_v34  ;;  %1466 = vpow2.f32 %v654_v54  ;;  %v684_v63 = vsel %vm581_vm1, %v1990_v58, 0.0 }
 0x1c0   :  { %1468 = vpow2.f32 %v656_v53 }
 0x1c1   :  { %1470 = vpow2.f32 %v658_v57 }
 0x1c2   :  { %v605_v49 = vpop.xlane.xlu2 %604 }
 0x1c3   :  { %v637_v59 = vsub.f32 %v1879_v50, %v605_v49 }
 0x1c4   :  { %v611_v46 = vpop.xlane.xlu1 %610 }
 0x1c5   :  { %v660_v61 = vmul.f32 1.442695, %v637_v59  ;;  %v1993_v47 = vpop.eup %1466  ;;  %v639_v62 = vsub.f32 %v1890_v60, %v611_v46 }
 0x1c6   :  { %v690_v23 = vsel %vm581_vm1, %v1993_v47, 0.0  ;;  %v2000_v50 = vpop.eup %1468 }
 0x1c7   :  { %1472 = vpow2.f32 %v660_v61  ;;  %685 = vadd.xlane.f32.xlu1 %v684_v63  ;;  %691 = vadd.xlane.f32.xlu2 %v690_v23  ;;  %v664_v1 = vmul.f32 1.442695, %v639_v62  ;;  %v2003_v7 = vpop.eup %1470  ;;  %v693_v12 = vsel %vm581_vm1, %v2000_v50, 0.0 }
 0x1c9   :  { %1474 = vpow2.f32 %v664_v1 }
 0x1ca   :  { %v608_v27 = vpop.xlane.xlu2 %607 }
 0x1cb   :  { %v638_v29 = vsub.f32 %v1910_v20, %v608_v27  ;;  %v696_v20 = vsel %vm581_vm1, %v2003_v7, 0.0 }
 0x1cd   :  { %v617_v5 = vpop.xlane.xlu0 %616  ;;  %v2006_v8 = vpop.eup %1472  ;;  %v662_v10 = vmul.f32 1.442695, %v638_v29 }
 0x1ce   :  { %v641_v60 = vsub.f32 %v1912_v31, %v617_v5  ;;  %v699_v13 = vsel %vm581_vm1, %v2006_v8, 0.0 }
 0x1cf   :  { %1476 = vpow2.f32 %v662_v10  ;;  %694 = vadd.xlane.f32.xlu1 %v693_v12  ;;  %700 = vadd.xlane.f32.xlu0 %v699_v13  ;;  %v2015_v15 = vpop.eup %1474 }
 0x1d0   :  { %v668_v11 = vmul.f32 1.442695, %v641_v60  ;;  %697 = vadd.xlane.f32.xlu2 %v696_v20  ;;  %v705_v33 = vsel %vm581_vm1, %v2015_v15, 0.0 }
 0x1d2   :  { %1478 = vpow2.f32 %v668_v11  ;;  %v614_v31 = vpop.xlane.xlu2 %613 }
 0x1d3   :  { %v640_v14 = vsub.f32 %v1895_v0, %v614_v31 }
 0x1d5   :  { %v2017_v16 = vpop.eup %1476  ;;  %v666_v17 = vmul.f32 1.442695, %v640_v14 }
 0x1d6   :  { %v702_v19 = vsel %vm581_vm1, %v2017_v16, 0.0 }
 0x1d7   :  { %1480 = vpow2.f32 %v666_v17  ;;  %703 = vadd.xlane.f32.xlu0 %v702_v19 }
 0x1d8   :  { %v2019_v18 = vpop.eup %1478  ;;  %706 = vadd.xlane.f32.xlu2 %v705_v33 }
 0x1d9   :  { %v711_v32 = vsel %vm581_vm1, %v2019_v18, 0.0 }
 0x1da   :  { %712 = vadd.xlane.f32.xlu1 %v711_v32  ;;  %v620_v0 = vpop.xlane.xlu0 %619 }
 0x1db   :  { %v642_v39 = vsub.f32 %v1956_v4, %v620_v0 }
 0x1dd   :  { %v629_v36 = vpop.xlane.xlu2 %628  ;;  %v2029_v41 = vpop.eup %1480  ;;  %v670_v37 = vmul.f32 1.442695, %v642_v39 }
 0x1de   :  { %v645_v21 = vsub.f32 %v1958_v6, %v629_v36  ;;  %v708_v43 = vsel %vm581_vm1, %v2029_v41, 0.0 }
 0x1df   :  { %1482 = vpow2.f32 %v670_v37  ;;  %709 = vadd.xlane.f32.xlu0 %v708_v43 }
 0x1e0   :  { %v676_v42 = vmul.f32 1.442695, %v645_v21 }
 0x1e2   :  { %1484 = vpow2.f32 %v676_v42  ;;  %v623_v44 = vpop.xlane.xlu0 %622 }
 0x1e3   :  { %v643_v45 = vsub.f32 %v1923_v48, %v623_v44 }
 0x1e5   :  { %v2034_v51 = vpop.eup %1482  ;;  %v672_v38 = vmul.f32 1.442695, %v643_v45 }
 0x1e6   :  { %v714_v4 = vsel %vm581_vm1, %v2034_v51, 0.0 }
 0x1e7   :  { %1486 = vpow2.f32 %v672_v38  ;;  %715 = vadd.xlane.f32.xlu1 %v714_v4 }
 0x1e8   :  { %v2036_v54 = vpop.eup %1484 }
 0x1e9   :  { %v723_v6 = vsel %vm581_vm1, %v2036_v54, 0.0 }
 0x1ea   :  { %724 = vadd.xlane.f32.xlu2 %v723_v6 }
 0x1ed   :  { %v2042_v35 = vpop.eup %1486 }
 0x1ee   :  { %v717_v55 = vsel %vm581_vm1, %v2042_v35, 0.0 }
 0x1ef   :  { %718 = vadd.xlane.f32.xlu0 %v717_v55 }
 0x224   :  { %v683_v48 = vpop.xlane.xlu0 %682 }
 0x225   :  { %1488 = vrcp.f32 %v683_v48 }
 0x22a   :  { %v680_v34 = vpop.xlane.xlu1 %679 }
 0x22b   :  { %v1489_v53 = vpop.eup %1488  ;;  %1490 = vrcp.f32 %v680_v34 }
 0x22c   :  { %v743_v57 = vmul.f32 %v1489_v53, %v1971_v26 }
 0x22e   :  { %v759_v49 = vpack.c.bf16 %v743_v57, %v743_v57 }
 0x230   :  { %1357 = vmatmul.msk.bf16.vlgmr.msrb.gmra.mxu0 %vm581_vm1, %v759_v49 }
 0x231   :  { %v1491_v59 = vpop.eup %1490  ;;  %959 = vmatpush.bf16.msrb.mxu0 %v1935_v22 }
 0x232   :  { %v742_v46 = vmul.f32 %v1491_v59, %v1976_v40  ;;  %v626_v61 = vpop.xlane.xlu1 %625  ;;  %v689_v62 = vpop.xlane.xlu2 %688 }
 0x233   :  { %v644_v63 = vsub.f32 %v1929_v56, %v626_v61  ;;  %1492 = vrcp.f32 %v689_v62 }
 0x234   :  { %v758_v23 = vpack.c.bf16 %v742_v46, %v742_v46 }
 0x235   :  { %v674_v1 = vmul.f32 1.442695, %v644_v63 }
 0x236   :  { %1356 = vmatmul.msk.bf16.vlgmr.msra.gmra.mxu3 %vm581_vm1, %v758_v23 }
 0x237   :  { %1494 = vpow2.f32 %v674_v1  ;;  %940 = vmatpush.bf16.msra.mxu3 %v1938_v24 }
 0x239   :  { %v1493_v26 = vpop.eup %1492 }
 0x23a   :  { %v745_v27 = vmul.f32 %v1493_v26, %v1982_v52  ;;  %v686_v5 = vpop.xlane.xlu1 %685  ;;  %v692_v22 = vpop.xlane.xlu2 %691 }
 0x23b   :  { %1496 = vrcp.f32 %v686_v5 }
 0x23c   :  { %v761_v29 = vpack.c.bf16 %v745_v27, %v745_v27  ;;  %1498 = vrcp.f32 %v692_v22 }
 0x23d   :  { %v2054_v40 = vpop.eup %1494 }
 0x23e   :  { %1359 = vmatmul.msk.bf16.vlgmr.msra.gmra.mxu2 %vm581_vm1, %v761_v29  ;;  %v720_v56 = vsel %vm581_vm1, %v2054_v40, 0.0 }
 0x23f   :  { %997 = vmatpush.bf16.msra.mxu2 %v1941_v25  ;;  %721 = vadd.xlane.f32.xlu1 %v720_v56 }
 0x241   :  { %v1497_v60 = vpop.eup %1496 }
 0x242   :  { %v1499_v24 = vpop.eup %1498  ;;  %v744_v10 = vmul.f32 %v1497_v60, %v1990_v58  ;;  %v695_v52 = vpop.xlane.xlu1 %694 }
 0x243   :  { %v701_v11 = vpop.xlane.xlu0 %700  ;;  %v746_v12 = vmul.f32 %v1499_v24, %v1993_v47  ;;  %1500 = vrcp.f32 %v695_v52  ;;  %v698_v13 = vpop.xlane.xlu2 %697 }
 0x244   :  { %v760_v20 = vpack.c.bf16 %v744_v10, %v744_v10  ;;  %1502 = vrcp.f32 %v701_v11 }
 0x245   :  { %v762_v31 = vpack.c.bf16 %v746_v12, %v746_v12  ;;  %1504 = vrcp.f32 %v698_v13 }
 0x246   :  { %1358 = vmatmul.msk.bf16.vlgmr.msra.gmra.mxu1 %vm581_vm1, %v760_v20 }
 0x247   :  { %1360 = vmatmul.msk.bf16.vlgmr.msrb.gmra.mxu3 %vm581_vm1, %v762_v31  ;;  %978 = vmatpush.bf16.msra.mxu1 %v1945_v28 }
 0x248   :  { %1016 = vmatpush.bf16.msrb.mxu3 %v1948_v30 }
 0x249   :  { %v1501_v25 = vpop.eup %1500 }
 0x24a   :  { %v747_v58 = vmul.f32 %v1501_v25, %v2000_v50  ;;  %v1503_v17 = vpop.eup %1502 }
 0x24b   :  { %v704_v14 = vpop.xlane.xlu0 %703  ;;  %v749_v19 = vmul.f32 %v1503_v17, %v2006_v8  ;;  %v707_v32 = vpop.xlane.xlu2 %706 }
 0x24c   :  { %1506 = vrcp.f32 %v704_v14  ;;  %v763_v47 = vpack.c.bf16 %v747_v58, %v747_v58  ;;  %v1505_v33 = vpop.eup %1504 }
 0x24d   :  { %v765_v0 = vpack.c.bf16 %v749_v19, %v749_v19  ;;  %v713_v36 = vpop.xlane.xlu1 %712  ;;  %1508 = vrcp.f32 %v707_v32  ;;  %v748_v28 = vmul.f32 %v1505_v33, %v2003_v7 }
 0x24e   :  { %1361 = vmatmul.msk.bf16.vlgmr.msra.gmra.mxu0 %vm581_vm1, %v763_v47  ;;  %1510 = vrcp.f32 %v713_v36  ;;  %v1432_v36 = vld [vmem:[#allocation7 + $0x8] sm:$0xff] }
 0x24f   :  { %1035 = vmatpush.bf16.msra.mxu0 %v1951_v2  ;;  %1363 = vmatmul.msk.bf16.vlgmr.msrb.gmra.mxu2 %vm581_vm1, %v765_v0  ;;  %v764_v8 = vpack.c.bf16 %v748_v28, %v748_v28 }
 0x250   :  { %1073 = vmatpush.bf16.msrb.mxu2 %v1954_v3 }
 0x252   :  { %v1507_v30 = vpop.eup %1506 }
 0x253   :  { %v750_v50 = vmul.f32 %v1507_v30, %v2017_v16  ;;  %v710_v21 = vpop.xlane.xlu0 %709  ;;  %v1509_v37 = vpop.eup %1508 }
 0x254   :  { %v1511_v42 = vpop.eup %1510  ;;  %1512 = vrcp.f32 %v710_v21  ;;  %v751_v2 = vmul.f32 %v1509_v37, %v2015_v15 }
 0x255   :  { %v766_v39 = vpack.c.bf16 %v750_v50, %v750_v50  ;;  %v753_v7 = vmul.f32 %v1511_v42, %v2019_v18 }
 0x256   :  { %1362 = vmatmul.msk.bf16.vlgmr.msrb.gmra.mxu1 %vm581_vm1, %v764_v8  ;;  %v767_v3 = vpack.c.bf16 %v751_v2, %v751_v2 }
 0x257   :  { %1364 = vmatmul.msk.bf16.vlgmr.msra.gmra.mxu3 %vm581_vm1, %v766_v39  ;;  %1054 = vmatpush.bf16.msrb.mxu1 %v1965_v9  ;;  %v769_v44 = vpack.c.bf16 %v753_v7, %v753_v7 }
 0x258   :  { %1139 = vmatpush.bf16.msra.mxu3 %v1432_v36 }
 0x25a   :  { %v716_v43 = vpop.xlane.xlu1 %715  ;;  %v1513_v16 = vpop.eup %1512 }
 0x25b   :  { %1514 = vrcp.f32 %v716_v43  ;;  %v752_v38 = vmul.f32 %v1513_v16, %v2029_v41 }
 0x25d   :  { %v725_v45 = vpop.xlane.xlu2 %724  ;;  %v768_v15 = vpack.c.bf16 %v752_v38, %v752_v38 }
 0x25e   :  { %1365 = vmatmul.msk.bf16.vlgmr.msrb.gmra.mxu0 %vm581_vm1, %v767_v3  ;;  %1516 = vrcp.f32 %v725_v45 }
 0x25f   :  { %1367 = vmatmul.msk.bf16.vlgmr.msra.gmra.mxu2 %vm581_vm1, %v769_v44 }
 0x261   :  { %v1515_v4 = vpop.eup %1514 }
 0x262   :  { %v754_v9 = vmul.f32 %v1515_v4, %v2034_v51  ;;  %v719_v6 = vpop.xlane.xlu0 %718 }
 0x263   :  { %1518 = vrcp.f32 %v719_v6 }
 0x264   :  { %v770_v18 = vpack.c.bf16 %v754_v9, %v754_v9  ;;  %v1517_v55 = vpop.eup %1516 }
 0x265   :  { %v757_v34 = vmul.f32 %v1517_v55, %v2036_v54 }
 0x266   :  { %1366 = vmatmul.msk.bf16.vlgmr.msra.gmra.mxu1 %vm581_vm1, %v768_v15 }
 0x267   :  { %1368 = vmatmul.msk.bf16.vlgmr.msrb.gmra.mxu3 %vm581_vm1, %v770_v18  ;;  %v773_v57 = vpack.c.bf16 %v757_v34, %v757_v34 }
 0x269   :  { %v1519_v48 = vpop.eup %1518 }
 0x26a   :  { %v755_v41 = vmul.f32 %v1519_v48, %v2042_v35 }
 0x26c   :  { %v771_v53 = vpack.c.bf16 %v755_v41, %v755_v41  ;;  %v1431_v41 = vld [vmem:[#allocation7] sm:$0xff] }
 0x26d   :  { %1140 = vmatpush.bf16.msra.mxu3 %v1431_v41 }
 0x26e   :  { %1369 = vmatmul.msk.bf16.vlgmr.msra.gmra.mxu0 %vm581_vm1, %v771_v53 }
 0x26f   :  { %1371 = vmatmul.msk.bf16.vlgmr.msrb.gmra.mxu2 %vm581_vm1, %v773_v57 }
 0x2ad   :  { %v809_v51 = vpop.f32.mrf.mxu0 }
 0x2ae   :  { %v1080_v62 = vsel %vm139_vm0, %v809_v51, 0.0 }
 0x2b2   :  { %v722_v49 = vpop.xlane.xlu1 %721 }
 0x2b3   :  { %1520 = vrcp.f32 %v722_v49 }
 0x2b5   :  { %v811_v59 = vpop.f32.mrf.mxu0 }
 0x2b9   :  { %v1521_v46 = vpop.eup %1520  ;;  %v790_v61 = vpop.f32.mrf.mxu3 }
 0x2ba   :  { %v756_v63 = vmul.f32 %v1521_v46, %v2054_v40  ;;  %v1079_v54 = vsel %vm139_vm0, %v790_v61, 0.0 }
 0x2bb   :  { %v1081_v23 = vadd.f32 %v1080_v62, %v1079_v54  ;;  %v1434_v62 = vld [vmem:[#allocation9 + $0x8] sm:$0xff]  ;;  %v1442_v54 = vld [vmem:[%s2167_s14 + $0x38] sm:$0xff] }
 0x2bc   :  { %v772_v35 = vpack.c.bf16 %v756_v63, %v756_v63  ;;  %1189 = vmatpush.bf16.msrb.mxu0 %v1434_v62  ;;  %v1433_v63 = vld [vmem:[#allocation9] sm:$0xff]  ;;  %1268 = vmatpush.bf16.msra.mxu1 %v1442_v54 }
 0x2be   :  { %1370 = vmatmul.msk.bf16.vlgmr.msrb.gmra.mxu1 %vm581_vm1, %v772_v35  ;;  %v1440_v35 = vld [vmem:[%s2167_s14 + $0x28] sm:$0xff] }
 0x2c0   :  { %1190 = vmatpush.bf16.msrb.mxu0 %v1433_v63 }
 0x2c1   :  { %v792_v1 = vpop.f32.mrf.mxu3  ;;  %v847_v26 = vpop.f32.mrf.mxu2 }
 0x2c2   :  { %v1084_v29 = vsel %vm139_vm0, %v847_v26, 0.0  ;;  %v1439_v1 = vld [vmem:[%s2167_s14 + $0x20] sm:$0xff] }
 0x2c3   :  { %v828_v27 = vpop.f32.mrf.mxu1 }
 0x2c4   :  { %v1082_v5 = vsel %vm139_vm0, %v828_v27, 0.0  ;;  %v1455_v27 = vld [vmem:[%s2164_s11] ss:$0 sm:$0xff] }
 0x2c5   :  { %v1083_v22 = vadd.f32 %v1082_v5, %v1081_v23  ;;  %v1441_v23 = vld [vmem:[%s2167_s14 + $0x30] sm:$0xff] }
 0x2c6   :  { %1269 = vmatpush.bf16.msra.mxu1 %v1441_v23 }
 0x2c7   :  { %v1085_v56 = vadd.f32 %v1084_v29, %v1083_v22  ;;  %v1154_v22 = vstv %s1381_s0  ;;  %v1151_v29 = vstv %s1147_s17 }
 0x2c9   :  { %v849_v60 = vpop.f32.mrf.mxu2 }
 0x2ca   :  { %v866_v24 = vpop.f32.mrf.mxu3  ;;  %1270 = vmatpush.bf16.msra.mxu1 %v1440_v35  ;;  %v1522_v60 = vld [vmem:[%s2155_s2] sm:$0xff] }
 0x2cb   :  { %v1086_v10 = vsel %vm139_vm0, %v866_v24, 0.0  ;;  %v830_v40 = vpop.f32.mrf.mxu1  ;;  %v885_v52 = vpop.f32.mrf.mxu0  ;;  %v1155_v24 = vmul.f32 %v1522_v60, %v1154_v22 }
 0x2cc   :  { %v1087_v11 = vadd.f32 %v1086_v10, %v1085_v56  ;;  %v1088_v12 = vsel %vm139_vm0, %v885_v52, 0.0  ;;  %v1523_v10 = vld [vmem:[%s2155_s2 + $0x8] sm:$0xff] }
 0x2cd   :  { %v1156_v40 = vmul.f32 %v1523_v10, %v1154_v22 }
 0x2ce   :  { %v1089_v13 = vadd.f32 %v1088_v12, %v1087_v11  ;;  %1271 = vmatpush.bf16.msra.mxu1 %v1439_v1 }
 0x2d2   :  { %v868_v20 = vpop.f32.mrf.mxu3  ;;  %v923_v31 = vpop.f32.mrf.mxu2 }
 0x2d3   :  { %v887_v25 = vpop.f32.mrf.mxu0  ;;  %v904_v58 = vpop.f32.mrf.mxu1  ;;  %v1092_v47 = vsel %vm139_vm0, %v923_v31, 0.0 }
 0x2d4   :  { %v1090_v14 = vsel %vm139_vm0, %v904_v58, 0.0  ;;  %v1438_v25 = vld [vmem:[%s2167_s14 + $0x18] sm:$0xff]  ;;  %v1437_v58 = vld [vmem:[%s2167_s14 + $0x10] sm:$0xff] }
 0x2d5   :  { %v1091_v17 = vadd.f32 %v1090_v14, %v1089_v13  ;;  %1272 = vmatpush.bf16.msra.mxu1 %v1438_v25  ;;  %v1436_v14 = vld [vmem:[%s2167_s14 + $0x8] sm:$0xff] }
 0x2d7   :  { %v1093_v19 = vadd.f32 %v1092_v47, %v1091_v17  ;;  %v1435_v17 = vld [vmem:[%s2167_s14] sm:$0xff] }
 0x2d9   :  { %1273 = vmatpush.bf16.msra.mxu1 %v1437_v58 }
 0x2da   :  { %v942_v32 = vpop.f32.mrf.mxu3  ;;  %v925_v33 = vpop.f32.mrf.mxu2 }
 0x2db   :  { %v961_v0 = vpop.f32.mrf.mxu0  ;;  %v1094_v28 = vsel %vm139_vm0, %v942_v32, 0.0  ;;  %v906_v30 = vpop.f32.mrf.mxu1 }
 0x2dc   :  { %v1095_v50 = vsel %vm139_vm0, %v961_v0, 0.0 }
 0x2dd   :  { %v1096_v8 = vadd.f32 %v1095_v50, %v1094_v28  ;;  %1274 = vmatpush.bf16.msra.mxu1 %v1436_v14  ;;  %v1457_v50 = vld [vmem:[%s2168_s15] ss:$0 sm:$0xff]  ;;  %s1647_s15 = smov 128  }
 0x2e1   :  { %1275 = vmatpush.bf16.msra.mxu1 %v1435_v17 }
 0x2e2   :  { %v944_v39 = vpop.f32.mrf.mxu3  ;;  %v999_v21 = vpop.f32.mrf.mxu2 }
 0x2e3   :  { %v963_v37 = vpop.f32.mrf.mxu0  ;;  %v980_v42 = vpop.f32.mrf.mxu1  ;;  %v1099_v43 = vsel %vm139_vm0, %v999_v21, 0.0  ;;  %v1282_v39 = vstv %s1382_s5  ;;  %v1285_v21 = vstv %s1383_s7 }
 0x2e4   :  { %v1097_v2 = vsel %vm139_vm0, %v980_v42, 0.0 }
 0x2e5   :  { %v1098_v7 = vadd.f32 %v1097_v2, %v1096_v8 }
 0x2e7   :  { %v1100_v3 = vadd.f32 %v1099_v43, %v1098_v7 }
 0x2ea   :  { %v1018_v16 = vpop.f32.mrf.mxu3  ;;  %v1001_v44 = vpop.f32.mrf.mxu2 }
 0x2eb   :  { %v1101_v45 = vsel %vm139_vm0, %v1018_v16, 0.0  ;;  %v1037_v38 = vpop.f32.mrf.mxu0  ;;  %v982_v9 = vpop.f32.mrf.mxu1 }
 0x2ec   :  { %v1102_v4 = vadd.f32 %v1101_v45, %v1100_v3  ;;  %v1103_v6 = vsel %vm139_vm0, %v1037_v38, 0.0 }
 0x2ee   :  { %v1104_v15 = vadd.f32 %v1103_v6, %v1102_v4 }
 0x2f2   :  { %v1020_v18 = vpop.f32.mrf.mxu3  ;;  %v1075_v55 = vpop.f32.mrf.mxu2 }
 0x2f3   :  { %v1039_v48 = vpop.f32.mrf.mxu0  ;;  %v1107_v49 = vsel %vm139_vm0, %v1075_v55, 0.0 }
 0x2fa   :  { %v1077_v34 = vpop.f32.mrf.mxu2 }
 0x33b   :  { %v1056_v53 = vpop.f32.mrf.mxu1 }
 0x33c   :  { %v1105_v57 = vsel %vm139_vm0, %v1056_v53, 0.0 }
 0x33d   :  { %v1106_v51 = vadd.f32 %v1105_v57, %v1104_v15 }
 0x33f   :  { %v1108_v59 = vadd.f32 %v1107_v49, %v1106_v51 }
 0x341   :  { %v1109_v46 = vpack.c.bf16 %v1108_v59, %v1093_v19  ;;  %v1456_v19 = vld [vmem:[%s2166_s13] ss:$0 sm:$0xff]  ;;  %s1646_s13 = smov [#allocation10]  }
 0x342   :  { %s1296_s14 = sshll.u32 %s1646_s13, 4  ;;  %s1297_s14 = int_to_ptr.vmem [resolvable:$true] %s1296_s14 }
 0x343   :  { %v1058_v61 = vpop.f32.mrf.mxu1  ;;  %1380 = vmatmul.msk.bf16.vlgmr.msra.gmra.mxu3 %vm139_vm0, %v1109_v46 }
 0x3c6   :  { %v1142_v26 = vpop.f32.mrf.mxu3 }
 0x3c7   :  { %v1143_v5 = vadd.f32 %v1455_v27, %v1142_v26 }
 0x3c9   :  { %v1152_v52 = vmul.f32 %v1151_v29, %v1143_v5 }
 0x3cb   :  { %v1157_v13 = vadd.f32 %v1155_v24, %v1152_v52 }
 0x3cd   :  { %v1283_v42 = vmul.f32 %v1282_v39, %v1157_v13 }
 0x3ce   :  { %v1144_v56 = vpop.f32.mrf.mxu3 }
 0x3cf   :  { %v1145_v11 = vadd.f32 %v1455_v27, %v1144_v56 }
 0x3d1   :  { %v1153_v12 = vmul.f32 %v1151_v29, %v1145_v11 }
 0x3d3   :  { %v1158_v20 = vadd.f32 %v1156_v40, %v1153_v12 }
 0x3d5   :  { %v1159_v31 = vpack.c.bf16 %v1158_v20, %v1157_v13  ;;  %v1284_v16 = vmul.f32 %v1282_v39, %v1158_v20 }
 0x3d7   :  { %1392 = vmatmul.msk.bf16.vlgmr.msrb.gmra.mxu0 %vm139_vm0, %v1159_v31 }
 0x454   :  { %v1192_v47 = vpop.f32.mrf.mxu0 }
 0x455   :  { %v1193_v32 = vadd.f32 %v1456_v19, %v1192_v47 }
 0x457   :  { %v1197_v36 = vmax.f32 %v1193_v32, 0.0 }
 0x45c   :  { %v1194_v33 = vpop.f32.mrf.mxu0 }
 0x45d   :  { %v1195_v0 = vadd.f32 %v1456_v19, %v1194_v33 }
 0x45f   :  { %v1198_v28 = vmax.f32 %v1195_v0, 0.0 }
 0x461   :  { %v1199_v30 = vpack.c.bf16 %v1198_v28, %v1197_v36 }
 0x463   :  { %1276 = vmatmul.bf16.vlgmr.msra.gmra.mxu1 %v1199_v30 }
 0x4e0   :  { %v1277_v8 = vpop.f32.mrf.mxu1 }
 0x4e1   :  { %v1278_v37 = vadd.f32 %v1457_v50, %v1277_v8 }
 0x4e3   :  { %v1286_v2 = vmul.f32 %v1285_v21, %v1278_v37 }
 0x4e5   :  { %v1288_v7 = vadd.f32 %v1286_v2, %v1283_v42 }
 0x4e7   :  { %1290 = vst.msk [vmem:[#allocation10] sm:$0xff] %vm139_vm0, %v1288_v7 }
 0x4e8   :  { %v1279_v43 = vpop.f32.mrf.mxu1 }
 0x4e9   :  { %v1280_v3 = vadd.f32 %v1457_v50, %v1279_v43 }
 0x4eb   :  { %v1287_v44 = vmul.f32 %v1285_v21, %v1280_v3 }
 0x4ed   :  { %v1289_v45 = vadd.f32 %v1287_v44, %v1284_v16 }
 0x4ef   :  { %1291 = vst.msk [vmem:[#allocation10 + $0x8] sm:$0xff] %vm139_vm0, %v1289_v45 }
 0x4f0   :  { %1304 = dma.vmem_to_hbm [thread:$0]  %s1297_s14, 256, %s1299_s29, [#allocation4], %s1647_s15, %s1647_s15, %s1648_s16  }
 0x4f1   :  { %1638 = dma.done.wait [#allocation4], 256  }
 0x4f2   :  { %1639 = vsyncadd [#allocation4], 4294967040 }
 0x4f3   :  { %1309 = vsyncpa [#allocation3], 1 }
 0x4f4   :  { %1310 = vsyncpa [#allocation8], 1 }
 0x4f5   :  { %1311 = vsyncpa [#allocation4], 1 }
 0x4f6   :  { %1312 = vsyncpa [#allocation5], 1 }

</bundles_post_ra>
